<compile_context>
chip_gen: v6e
topology: v6e:2x2x1
jax: 0.10.0
libtpu: 0.0.40
codegen_flags: <defaults>
</compile_context>

<pallas_src>
import numpy as np
import jax
import jax.numpy as jnp
from jax.experimental import pallas as pl
from jax.experimental.pallas import tpu as pltpu

# ---- hyper-parameters (small shapes consistent with the module structure) ----
D_MODEL = 32
D_STATE = 16
D_CONV = 4
EXPAND = 2
D_INNER = EXPAND * D_MODEL                 # 64
DT_RANK = -(-D_MODEL // 16)                # ceil(d_model / 16) = 2
D_INNER2 = 2 * D_INNER                     # fwd|bwd folded on lanes = 128

BATCH = 2
SEQ = 8


def _sigmoid(x):
    # single EUP tanh instead of exp + full-precision reciprocal sequence
    return 0.5 * (jnp.tanh(0.5 * x) + 1.0)


def _silu(x):
    return x * _sigmoid(x)


def _softplus(x):
    return jnp.maximum(x, 0.0) + jnp.log(1.0 + jnp.exp(-jnp.abs(x)))


# --------------------------------------------------------------------------- #
# Fused kernel: fwd Mamba + bwd Mamba + output_linear, one batch element / step
# --------------------------------------------------------------------------- #
def bimamba_kernel(x_ref, w_in_ref, conv_w_ref, conv_b_ref, w_dt_ref, dt_bias_ref,
                   w_bct_ref, a_logT_ref, d_ref, w_out_ref, b_out_ref, o_ref):
    L = x_ref.shape[0]
    DI, DI2 = D_INNER, D_INNER2
    P = D_CONV - 1
    f32 = jnp.float32
    x = x_ref[...].astype(f32)                                              # (L, 32)

    # lane mask: lanes [0, 64) = forward stream, [64, 128) = backward (scan-ordered) stream
    lane = jax.lax.broadcasted_iota(jnp.int32, (1, DI2), 1)
    is_fwd = lane < DI                                                      # (1, 128)

    # (L, L) anti-identity; applied on the MXU it flips the time axis of a slab (exact 0/1).
    row = jax.lax.broadcasted_iota(jnp.int32, (L, L), 0)
    col = jax.lax.broadcasted_iota(jnp.int32, (L, L), 1)
    p_rev = (row + col == L - 1).astype(f32)                                # (L, L)

    def rev_bwd(a):
        """Flip the time axis of the backward lane-half only."""
        return jnp.where(is_fwd, a, jnp.dot(p_rev, a, preferred_element_type=f32))

    # ---- fused in_proj: [x_f | x_b | z_f | z_b] in one (L,32)@(32,256) matmul ----
    xz = jnp.dot(x, w_in_ref[...], preferred_element_type=f32)              # (L, 256)
    xin = rev_bwd(xz[:, :DI2])      # conv/scan input; bwd half now in reversed-time order
    z = xz[:, DI2:]                 # gates stay in natural time order      # (L, 128)

    # ---- depthwise conv: both halves are plain causal convs over one shared padded buffer ----
    xpad = jnp.concatenate([jnp.zeros((P, DI2), f32), xin], axis=0)         # (L+P, 128)
    conv_w = conv_w_ref[...]                                                # (4, 128) [f|b]
    acc = jnp.zeros((L, DI2), f32) + conv_b_ref[...]
    for k in range(D_CONV):
        acc = acc + xpad[k:k + L, :] * conv_w[k:k + 1, :]
    u = _silu(acc)                                                          # (L, 128)

    # ---- dt: fused low-rank projection (block-diag per direction) + softplus ----
    dt = _softplus(jnp.dot(u, w_dt_ref[...], preferred_element_type=f32)
                   + dt_bias_ref[...])                                      # (L, 128)
    dtu = dt * u                                                            # (L, 128)

    # ---- B^T / C^T for both directions directly in (state, scan-time) layout ----
    bct = jax.lax.dot_general(w_bct_ref[...], u, (((1,), (1,)), ((), ())),
                              preferred_element_type=f32)                   # (64, L)
    BT_f, BT_b = bct[0:D_STATE, :], bct[D_STATE:2 * D_STATE, :]
    CT_f, CT_b = bct[2 * D_STATE:3 * D_STATE, :], bct[3 * D_STATE:, :]

    A_T = -jnp.exp(a_logT_ref[...])                                         # (16, 128)

    # ---- hoist: everything off the h-dependency chain precomputed for all L steps ----
    dA, dBu, C_bc = [], [], []
    for i in range(L):
        dA.append(jnp.exp(dt[i:i + 1, :] * A_T))                            # (16, 128)
        b_i = jnp.where(is_fwd, BT_f[:, i:i + 1], BT_b[:, i:i + 1])         # (16, 128)
        dBu.append(dtu[i:i + 1, :] * b_i)                                   # (16, 128)
        C_bc.append(jnp.where(is_fwd, CT_f[:, i:i + 1], CT_b[:, i:i + 1]))  # (16, 128)

    # ---- serial recurrence: only `h = dA*h + dBu` remains on the critical path ----
    h = jnp.zeros((D_STATE, DI2), f32)
    hs = []
    for i in range(L):
        h = dA[i] * h + dBu[i]
        hs.append(h)

    # ---- deferred C contraction + D skip (off the critical path) ----
    y_scan = jnp.concatenate(
        [jnp.sum(hs[i] * C_bc[i], axis=0, keepdims=True) for i in range(L)],
        axis=0)                                                             # (L, 128)
    y_scan = y_scan + u * d_ref[...]        # u's bwd half is scan-ordered too: consistent

    # ---- back to time order on bwd lanes, gate, fused out_proj + bidirectional combine ----
    y = rev_bwd(y_scan) * _silu(z)
    o_ref[...] = (jnp.dot(y, w_out_ref[...], preferred_element_type=f32)
                  + b_out_ref[...]).astype(o_ref.dtype)


# --------------------------------------------------------------------------- #
# Weight prep: fold per-direction params into fused, lane-concatenated weights
# --------------------------------------------------------------------------- #
def build_fused_weights(params):
    hp = jax.lax.Precision.HIGHEST          # keep the f32 weight fusion exact
    mm = lambda a, b: jnp.dot(a, b, precision=hp)
    pf, pb = params["fwd"], params["bwd"]
    z_ii = jnp.zeros((D_INNER, D_INNER), jnp.float32)
    z_si = jnp.zeros((D_STATE, D_INNER), jnp.float32)

    w_in = jnp.concatenate([pf["w_in_x"], pb["w_in_x"],
                            pf["w_in_z"], pb["w_in_z"]], axis=1)            # (32, 256)
    # both halves are causal inside the kernel (bwd input pre-reversed), so natural tap order
    conv_w = jnp.concatenate([pf["conv_w"], pb["conv_w"]], axis=1)          # (4, 128)
    conv_b = jnp.concatenate([pf["conv_b"], pb["conv_b"]], axis=1)          # (1, 128)
    # low-rank dt projection pre-fused, block-diagonal across directions
    w_dt = jnp.concatenate([
        jnp.concatenate([mm(pf["w_x_dt"], pf["w_dt"]), z_ii], axis=1),
        jnp.concatenate([z_ii, mm(pb["w_x_dt"], pb["w_dt"])], axis=1)], axis=0)  # (128, 128)
    dt_bias = jnp.concatenate([pf["dt_bias"], pb["dt_bias"]], axis=1)       # (1, 128)
    # B/C projections, transposed + block-diagonal: rows = [BT_f|BT_b|CT_f|CT_b]
    w_bct = jnp.concatenate([
        jnp.concatenate([pf["w_x_B"].T, z_si], axis=1),
        jnp.concatenate([z_si, pb["w_x_B"].T], axis=1),
        jnp.concatenate([pf["w_x_C"].T, z_si], axis=1),
        jnp.concatenate([z_si, pb["w_x_C"].T], axis=1)], axis=0)            # (64, 128)
    a_logT = jnp.concatenate([pf["A_logT"], pb["A_logT"]], axis=1)          # (16, 128)
    d_all = jnp.concatenate([pf["D"], pb["D"]], axis=1)                     # (1, 128)
    # out_proj fused with output_linear halves
    w_out = jnp.concatenate([mm(pf["w_out"], params["w_out1"]),
                             mm(pb["w_out"], params["w_out2"])], axis=0)    # (128, 32)
    b_out = params["b_out"]                                                 # (1, 32)
    return [w_in, conv_w, conv_b, w_dt, dt_bias, w_bct, a_logT, d_all, w_out, b_out]


@jax.jit
def bidirectional_mamba(x, params):
    weights = build_fused_weights(params)
    B, L, D = x.shape
    in_specs = [pl.BlockSpec((None, L, D), lambda b: (b, 0, 0))]
    in_specs += [pl.BlockSpec(tuple(w.shape), lambda b: (0, 0)) for w in weights]
    grid_spec = pltpu.PrefetchScalarGridSpec(
        num_scalar_prefetch=0,
        grid=(B,),
        in_specs=in_specs,
        out_specs=pl.BlockSpec((None, L, D), lambda b: (b, 0, 0)),
    )
    # grid=(B,) "parallel": one batch element per TensorCore on v7x.  On single-TC v5e/v6e,
    # fold the batch into one grid step ((B*L, D) rows, (B*d_state, 128) state) instead to
    # amortize the per-grid-step overhead and raise MXU row fill.
    return pl.pallas_call(
        bimamba_kernel,
        out_shape=jax.ShapeDtypeStruct((B, L, D), jnp.float32),
        grid_spec=grid_spec,
        compiler_params=pltpu.CompilerParams(dimension_semantics=("parallel",)),
    )(x, *weights)


# --------------------------------------------------------------------------- #
# Deterministic parameter init (synthetic; mirrors the module's shapes)
# --------------------------------------------------------------------------- #
def init_mamba_params(key):
    ks = jax.random.split(key, 10)
    s_in = 1.0 / np.sqrt(D_MODEL)
    s_inner = 1.0 / np.sqrt(D_INNER)
    p = {}
    p["w_in_x"] = jax.random.normal(ks[0], (D_MODEL, D_INNER), jnp.float32) * s_in
    p["w_in_z"] = jax.random.normal(ks[1], (D_MODEL, D_INNER), jnp.float32) * s_in
    p["conv_w"] = jax.random.normal(ks[2], (D_CONV, D_INNER), jnp.float32) / np.sqrt(D_CONV)
    p["conv_b"] = jax.random.normal(ks[3], (1, D_INNER), jnp.float32) * 0.1
    p["w_x_dt"] = jax.random.normal(ks[4], (D_INNER, DT_RANK), jnp.float32) * s_inner
    p["w_x_B"] = jax.random.normal(ks[5], (D_INNER, D_STATE), jnp.float32) * s_inner
    p["w_x_C"] = jax.random.normal(ks[6], (D_INNER, D_STATE), jnp.float32) * s_inner
    p["w_dt"] = jax.random.normal(ks[7], (DT_RANK, D_INNER), jnp.float32) / np.sqrt(DT_RANK)
    dt_target = jnp.exp(jax.random.uniform(ks[8], (1, D_INNER), jnp.float32,
                                           minval=np.log(1e-3), maxval=np.log(1e-1)))
    p["dt_bias"] = jnp.log(jnp.expm1(dt_target))                # inverse softplus
    p["A_logT"] = jnp.tile(jnp.log(jnp.arange(1, D_STATE + 1, dtype=jnp.float32))[:, None],
                           (1, D_INNER))                        # (d_state, d_inner)
    p["D"] = jnp.ones((1, D_INNER), jnp.float32)
    p["w_out"] = jax.random.normal(ks[9], (D_INNER, D_MODEL), jnp.float32) * s_inner
    return p


# --------------------------------------------------------------------------- #
# Pure-JAX reference (for correctness check; un-fused, uses flips like PyTorch)
# --------------------------------------------------------------------------- #
def mamba_ref(x, p):
    B, L, _ = x.shape
    xin = x @ p["w_in_x"]
    z = x @ p["w_in_z"]
    xpad = jnp.pad(xin, ((0, 0), (D_CONV - 1, 0), (0, 0)))
    acc = jnp.zeros_like(xin) + p["conv_b"]
    for k in range(D_CONV):
        acc = acc + xpad[:, k:k + L, :] * p["conv_w"][k]
    u = acc * _sigmoid(acc)
    dt = _softplus((u @ p["w_x_dt"]) @ p["w_dt"] + p["dt_bias"])          # (B, L, d_inner)
    Bm = u @ p["w_x_B"]                                                   # (B, L, d_state)
    Cm = u @ p["w_x_C"]
    A_T = -jnp.exp(p["A_logT"])                                           # (d_state, d_inner)
    h = jnp.zeros((B, D_STATE, D_INNER), jnp.float32)
    ys = []
    for t in range(L):
        dA = jnp.exp(dt[:, t, None, :] * A_T[None])
        dBu = (dt[:, t, None, :] * u[:, t, None, :]) * Bm[:, t, :, None]
        h = dA * h + dBu
        ys.append(jnp.sum(h * Cm[:, t, :, None], axis=1))
    y = jnp.stack(ys, axis=1) + u * p["D"]
    y = y * (z * _sigmoid(z))
    return y @ p["w_out"]


def bidirectional_ref(x, params):
    fwd = mamba_ref(x, params["fwd"])
    bwd = jnp.flip(mamba_ref(jnp.flip(x, axis=1), params["bwd"]), axis=1)
    return fwd @ params["w_out1"] + bwd @ params["w_out2"] + params["b_out"]


if __name__ == "__main__":
    key = jax.random.PRNGKey(0)
    kx, kf, kb, ko = jax.random.split(key, 4)
    ko1, ko2, kob = jax.random.split(ko, 3)

    x = jax.random.normal(kx, (BATCH, SEQ, D_MODEL), jnp.float32)
    params = {
        "fwd": init_mamba_params(kf),
        "bwd": init_mamba_params(kb),
        "w_out1": jax.random.normal(ko1, (D_MODEL, D_MODEL), jnp.float32) / np.sqrt(2 * D_MODEL),
        "w_out2": jax.random.normal(ko2, (D_MODEL, D_MODEL), jnp.float32) / np.sqrt(2 * D_MODEL),
        "b_out": jax.random.normal(kob, (1, D_MODEL), jnp.float32) * 0.1,
    }

    out = jax.block_until_ready(bidirectional_mamba(x, params))

    # Reference at full f32 matmul precision.  Tolerance tightened 10x vs. previous version;
    # the remaining margin only covers possible MXU f32-emulation pass-count differences
    # between Mosaic's in-kernel dots and the XLA reference (an all-f32 match is ~1e-6).
    with jax.default_matmul_precision("highest"):
        ref = bidirectional_ref(x, params)

    assert out.shape == (BATCH, SEQ, D_MODEL)
    np.testing.assert_allclose(np.asarray(out), np.asarray(ref), rtol=2e-3, atol=2e-3)
    print("KERNEL_OK")
</pallas_src>

<mosaic_0001>
module attributes {stable_mosaic.version = 11 : i64} {
  func.func @bimamba_kernel(%arg0: i32, %arg1: memref<1x8x32xf32, #tpu.memory_space<vmem>>, %arg2: memref<32x256xf32, #tpu.memory_space<vmem>>, %arg3: memref<4x128xf32, #tpu.memory_space<vmem>>, %arg4: memref<1x128xf32, #tpu.memory_space<vmem>>, %arg5: memref<128x128xf32, #tpu.memory_space<vmem>>, %arg6: memref<1x128xf32, #tpu.memory_space<vmem>>, %arg7: memref<64x128xf32, #tpu.memory_space<vmem>>, %arg8: memref<16x128xf32, #tpu.memory_space<vmem>>, %arg9: memref<1x128xf32, #tpu.memory_space<vmem>>, %arg10: memref<128x32xf32, #tpu.memory_space<vmem>>, %arg11: memref<1x32xf32, #tpu.memory_space<vmem>>, %arg12: memref<1x8x32xf32, #tpu.memory_space<vmem>>) attributes {dimension_semantics = [#tpu.dimension_semantics<parallel>], iteration_bounds = array<i64: 2>, scalar_prefetch = 0 : i64, scratch_operands = 0 : i64, tpu.core_type = #tpu.core_type<tc>, window_params = [{transform_indices = @transform_0, window_bounds = array<i64: 1, 8, 32>}, {pipeline_mode = #tpu.pipeline_mode<synchronous>, transform_indices = @transform_1, window_bounds = array<i64: 32, 256>}, {pipeline_mode = #tpu.pipeline_mode<synchronous>, transform_indices = @transform_2, window_bounds = array<i64: 4, 128>}, {pipeline_mode = #tpu.pipeline_mode<synchronous>, transform_indices = @transform_3, window_bounds = array<i64: 1, 128>}, {pipeline_mode = #tpu.pipeline_mode<synchronous>, transform_indices = @transform_4, window_bounds = array<i64: 128, 128>}, {pipeline_mode = #tpu.pipeline_mode<synchronous>, transform_indices = @transform_5, window_bounds = array<i64: 1, 128>}, {pipeline_mode = #tpu.pipeline_mode<synchronous>, transform_indices = @transform_6, window_bounds = array<i64: 64, 128>}, {pipeline_mode = #tpu.pipeline_mode<synchronous>, transform_indices = @transform_7, window_bounds = array<i64: 16, 128>}, {pipeline_mode = #tpu.pipeline_mode<synchronous>, transform_indices = @transform_8, window_bounds = array<i64: 1, 128>}, {pipeline_mode = #tpu.pipeline_mode<synchronous>, transform_indices = @transform_9, window_bounds = array<i64: 128, 32>}, {pipeline_mode = #tpu.pipeline_mode<synchronous>, transform_indices = @transform_10, window_bounds = array<i64: 1, 32>}, {transform_indices = @transform_11, window_bounds = array<i64: 1, 8, 32>}]} {
    %c0 = arith.constant 0 : index
    %c0_0 = arith.constant 0 : index
    %c0_1 = arith.constant 0 : index
    %0 = vector.load %arg1[%c0, %c0_0, %c0_1] : memref<1x8x32xf32, #tpu.memory_space<vmem>>, vector<1x8x32xf32>
    %1 = vector.shape_cast %0 : vector<1x8x32xf32> to vector<8x32xf32>
    %2 = tpu.iota {dimensions = array<i32: 1>} : vector<1x128xi32>
    %c64_i32 = arith.constant 64 : i32
    %3 = vector.broadcast %c64_i32 : i32 to vector<1x128xi32>
    %4 = arith.cmpi slt, %2, %3 : vector<1x128xi32>
    %5 = tpu.iota {dimensions = array<i32: 0>} : vector<8x8xi32>
    %6 = tpu.iota {dimensions = array<i32: 1>} : vector<8x8xi32>
    %7 = arith.addi %5, %6 : vector<8x8xi32>
    %c7_i32 = arith.constant 7 : i32
    %8 = vector.broadcast %c7_i32 : i32 to vector<8x8xi32>
    %9 = arith.cmpi eq, %7, %8 : vector<8x8xi32>
    %10 = arith.extui %9 : vector<8x8xi1> to vector<8x8xi32>
    %11 = arith.sitofp %10 : vector<8x8xi32> to vector<8x8xf32>
    %c0_2 = arith.constant 0 : index
    %c0_3 = arith.constant 0 : index
    %12 = vector.load %arg2[%c0_2, %c0_3] : memref<32x256xf32, #tpu.memory_space<vmem>>, vector<32x256xf32>
    %cst = arith.constant dense<0.000000e+00> : vector<8x256xf32>
    %13 = tpu.matmul %1, %12, %cst {dimension_numbers = #tpu.dot_dimension_numbers<[1], [0], [0], [1], [0, 0, 1, 1], [], []>} : vector<8x32xf32>, vector<32x256xf32>, vector<8x256xf32> -> vector<8x256xf32>
    %14 = vector.extract_strided_slice %13 {offsets = [0, 0], sizes = [8, 128], strides = [1, 1]} : vector<8x256xf32> to vector<8x128xf32>
    %cst_4 = arith.constant dense<0.000000e+00> : vector<8x128xf32>
    %15 = tpu.matmul %11, %14, %cst_4 {dimension_numbers = #tpu.dot_dimension_numbers<[1], [0], [0], [1], [0, 0, 1, 1], [], []>} : vector<8x8xf32>, vector<8x128xf32>, vector<8x128xf32> -> vector<8x128xf32>
    %16 = vector.shape_cast %4 : vector<1x128xi1> to vector<1x128xi1>
    %17 = vector.broadcast %16 : vector<1x128xi1> to vector<8x128xi1>
    %18 = arith.select %17, %14, %15 : vector<8x128xi1>, vector<8x128xf32>
    %19 = vector.extract_strided_slice %13 {offsets = [0, 128], sizes = [8, 128], strides = [1, 1]} : vector<8x256xf32> to vector<8x128xf32>
    %cst_5 = arith.constant 0.000000e+00 : f32
    %20 = vector.broadcast %cst_5 : f32 to vector<3x128xf32>
    %21 = tpu.concatenate %20, %18 in 0 : vector<3x128xf32>, vector<8x128xf32> -> vector<11x128xf32>
    %c0_6 = arith.constant 0 : index
    %c0_7 = arith.constant 0 : index
    %22 = vector.load %arg3[%c0_6, %c0_7] : memref<4x128xf32, #tpu.memory_space<vmem>>, vector<4x128xf32>
    %cst_8 = arith.constant 0.000000e+00 : f32
    %23 = vector.broadcast %cst_8 : f32 to vector<8x128xf32>
    %c0_9 = arith.constant 0 : index
    %c0_10 = arith.constant 0 : index
    %24 = vector.load %arg4[%c0_9, %c0_10] : memref<1x128xf32, #tpu.memory_space<vmem>>, vector<1x128xf32>
    %25 = vector.broadcast %24 : vector<1x128xf32> to vector<8x128xf32>
    %26 = arith.addf %23, %25 : vector<8x128xf32>
    %27 = vector.extract_strided_slice %21 {offsets = [0, 0], sizes = [8, 128], strides = [1, 1]} : vector<11x128xf32> to vector<8x128xf32>
    %28 = vector.extract_strided_slice %22 {offsets = [0, 0], sizes = [1, 128], strides = [1, 1]} : vector<4x128xf32> to vector<1x128xf32>
    %29 = vector.broadcast %28 : vector<1x128xf32> to vector<8x128xf32>
    %30 = arith.mulf %27, %29 : vector<8x128xf32>
    %31 = arith.addf %26, %30 : vector<8x128xf32>
    %32 = vector.extract_strided_slice %21 {offsets = [1, 0], sizes = [8, 128], strides = [1, 1]} : vector<11x128xf32> to vector<8x128xf32>
    %33 = vector.extract_strided_slice %22 {offsets = [1, 0], sizes = [1, 128], strides = [1, 1]} : vector<4x128xf32> to vector<1x128xf32>
    %34 = vector.broadcast %33 : vector<1x128xf32> to vector<8x128xf32>
    %35 = arith.mulf %32, %34 : vector<8x128xf32>
    %36 = arith.addf %31, %35 : vector<8x128xf32>
    %37 = vector.extract_strided_slice %21 {offsets = [2, 0], sizes = [8, 128], strides = [1, 1]} : vector<11x128xf32> to vector<8x128xf32>
    %38 = vector.extract_strided_slice %22 {offsets = [2, 0], sizes = [1, 128], strides = [1, 1]} : vector<4x128xf32> to vector<1x128xf32>
    %39 = vector.broadcast %38 : vector<1x128xf32> to vector<8x128xf32>
    %40 = arith.mulf %37, %39 : vector<8x128xf32>
    %41 = arith.addf %36, %40 : vector<8x128xf32>
    %42 = vector.extract_strided_slice %21 {offsets = [3, 0], sizes = [8, 128], strides = [1, 1]} : vector<11x128xf32> to vector<8x128xf32>
    %43 = vector.extract_strided_slice %22 {offsets = [3, 0], sizes = [1, 128], strides = [1, 1]} : vector<4x128xf32> to vector<1x128xf32>
    %44 = vector.broadcast %43 : vector<1x128xf32> to vector<8x128xf32>
    %45 = arith.mulf %42, %44 : vector<8x128xf32>
    %46 = arith.addf %41, %45 : vector<8x128xf32>
    %cst_11 = arith.constant 5.000000e-01 : f32
    %47 = vector.broadcast %cst_11 : f32 to vector<8x128xf32>
    %48 = arith.mulf %47, %46 : vector<8x128xf32>
    %49 = math.tanh %48 : vector<8x128xf32>
    %cst_12 = arith.constant 1.000000e+00 : f32
    %50 = vector.broadcast %cst_12 : f32 to vector<8x128xf32>
    %51 = arith.addf %49, %50 : vector<8x128xf32>
    %cst_13 = arith.constant 5.000000e-01 : f32
    %52 = vector.broadcast %cst_13 : f32 to vector<8x128xf32>
    %53 = arith.mulf %52, %51 : vector<8x128xf32>
    %54 = arith.mulf %46, %53 : vector<8x128xf32>
    %c0_14 = arith.constant 0 : index
    %c0_15 = arith.constant 0 : index
    %55 = vector.load %arg5[%c0_14, %c0_15] : memref<128x128xf32, #tpu.memory_space<vmem>>, vector<128x128xf32>
    %cst_16 = arith.constant dense<0.000000e+00> : vector<8x128xf32>
    %56 = tpu.matmul %54, %55, %cst_16 {dimension_numbers = #tpu.dot_dimension_numbers<[1], [0], [0], [1], [0, 0, 1, 1], [], []>} : vector<8x128xf32>, vector<128x128xf32>, vector<8x128xf32> -> vector<8x128xf32>
    %c0_17 = arith.constant 0 : index
    %c0_18 = arith.constant 0 : index
    %57 = vector.load %arg6[%c0_17, %c0_18] : memref<1x128xf32, #tpu.memory_space<vmem>>, vector<1x128xf32>
    %58 = vector.broadcast %57 : vector<1x128xf32> to vector<8x128xf32>
    %59 = arith.addf %56, %58 : vector<8x128xf32>
    %cst_19 = arith.constant 0.000000e+00 : f32
    %60 = vector.broadcast %cst_19 : f32 to vector<8x128xf32>
    %61 = arith.maximumf %59, %60 : vector<8x128xf32>
    %62 = math.absf %59 : vector<8x128xf32>
    %cst_20 = arith.constant 0.000000e+00 : f32
    %63 = vector.broadcast %cst_20 : f32 to vector<8x128xf32>
    %64 = arith.subf %63, %62 : vector<8x128xf32>
    %65 = math.exp %64 : vector<8x128xf32>
    %cst_21 = arith.constant 1.000000e+00 : f32
    %66 = vector.broadcast %cst_21 : f32 to vector<8x128xf32>
    %67 = arith.addf %66, %65 : vector<8x128xf32>
    %68 = math.log %67 : vector<8x128xf32>
    %69 = arith.addf %61, %68 : vector<8x128xf32>
    %70 = arith.mulf %69, %54 : vector<8x128xf32>
    %c0_22 = arith.constant 0 : index
    %c0_23 = arith.constant 0 : index
    %71 = vector.load %arg7[%c0_22, %c0_23] : memref<64x128xf32, #tpu.memory_space<vmem>>, vector<64x128xf32>
    %cst_24 = arith.constant dense<0.000000e+00> : vector<64x8xf32>
    %72 = tpu.matmul %71, %54, %cst_24 {dimension_numbers = #tpu.dot_dimension_numbers<[1], [1], [0], [0], [0, 0, 1, 0], [], []>} : vector<64x128xf32>, vector<8x128xf32>, vector<64x8xf32> -> vector<64x8xf32>
    %73 = vector.extract_strided_slice %72 {offsets = [0, 0], sizes = [16, 8], strides = [1, 1]} : vector<64x8xf32> to vector<16x8xf32>
    %74 = vector.extract_strided_slice %72 {offsets = [16, 0], sizes = [16, 8], strides = [1, 1]} : vector<64x8xf32> to vector<16x8xf32>
    %75 = vector.extract_strided_slice %72 {offsets = [32, 0], sizes = [16, 8], strides = [1, 1]} : vector<64x8xf32> to vector<16x8xf32>
    %76 = vector.extract_strided_slice %72 {offsets = [48, 0], sizes = [16, 8], strides = [1, 1]} : vector<64x8xf32> to vector<16x8xf32>
    %c0_25 = arith.constant 0 : index
    %c0_26 = arith.constant 0 : index
    %77 = vector.load %arg8[%c0_25, %c0_26] : memref<16x128xf32, #tpu.memory_space<vmem>>, vector<16x128xf32>
    %78 = math.exp %77 : vector<16x128xf32>
    %cst_27 = arith.constant 0.000000e+00 : f32
    %79 = vector.broadcast %cst_27 : f32 to vector<16x128xf32>
    %80 = arith.subf %79, %78 : vector<16x128xf32>
    %81 = vector.extract_strided_slice %69 {offsets = [0, 0], sizes = [1, 128], strides = [1, 1]} : vector<8x128xf32> to vector<1x128xf32>
    %82 = vector.broadcast %81 : vector<1x128xf32> to vector<16x128xf32>
    %83 = arith.mulf %82, %80 : vector<16x128xf32>
    %84 = math.exp %83 : vector<16x128xf32>
    %85 = vector.extract_strided_slice %73 {offsets = [0, 0], sizes = [16, 1], strides = [1, 1]} : vector<16x8xf32> to vector<16x1xf32>
    %86 = vector.extract_strided_slice %74 {offsets = [0, 0], sizes = [16, 1], strides = [1, 1]} : vector<16x8xf32> to vector<16x1xf32>
    %87 = vector.shape_cast %4 : vector<1x128xi1> to vector<1x128xi1>
    %88 = vector.broadcast %87 : vector<1x128xi1> to vector<16x128xi1>
    %89 = vector.shape_cast %85 : vector<16x1xf32> to vector<16x1xf32>
    %90 = vector.broadcast %89 : vector<16x1xf32> to vector<16x128xf32>
    %91 = vector.shape_cast %86 : vector<16x1xf32> to vector<16x1xf32>
    %92 = vector.broadcast %91 : vector<16x1xf32> to vector<16x128xf32>
    %93 = arith.select %88, %90, %92 : vector<16x128xi1>, vector<16x128xf32>
    %94 = vector.extract_strided_slice %70 {offsets = [0, 0], sizes = [1, 128], strides = [1, 1]} : vector<8x128xf32> to vector<1x128xf32>
    %95 = vector.broadcast %94 : vector<1x128xf32> to vector<16x128xf32>
    %96 = arith.mulf %95, %93 : vector<16x128xf32>
    %97 = vector.extract_strided_slice %75 {offsets = [0, 0], sizes = [16, 1], strides = [1, 1]} : vector<16x8xf32> to vector<16x1xf32>
    %98 = vector.extract_strided_slice %76 {offsets = [0, 0], sizes = [16, 1], strides = [1, 1]} : vector<16x8xf32> to vector<16x1xf32>
    %99 = vector.shape_cast %4 : vector<1x128xi1> to vector<1x128xi1>
    %100 = vector.broadcast %99 : vector<1x128xi1> to vector<16x128xi1>
    %101 = vector.shape_cast %97 : vector<16x1xf32> to vector<16x1xf32>
    %102 = vector.broadcast %101 : vector<16x1xf32> to vector<16x128xf32>
    %103 = vector.shape_cast %98 : vector<16x1xf32> to vector<16x1xf32>
    %104 = vector.broadcast %103 : vector<16x1xf32> to vector<16x128xf32>
    %105 = arith.select %100, %102, %104 : vector<16x128xi1>, vector<16x128xf32>
    %106 = vector.extract_strided_slice %69 {offsets = [1, 0], sizes = [1, 128], strides = [1, 1]} : vector<8x128xf32> to vector<1x128xf32>
    %107 = vector.broadcast %106 : vector<1x128xf32> to vector<16x128xf32>
    %108 = arith.mulf %107, %80 : vector<16x128xf32>
    %109 = math.exp %108 : vector<16x128xf32>
    %110 = vector.extract_strided_slice %73 {offsets = [0, 1], sizes = [16, 1], strides = [1, 1]} : vector<16x8xf32> to vector<16x1xf32>
    %111 = vector.extract_strided_slice %74 {offsets = [0, 1], sizes = [16, 1], strides = [1, 1]} : vector<16x8xf32> to vector<16x1xf32>
    %112 = vector.shape_cast %4 : vector<1x128xi1> to vector<1x128xi1>
    %113 = vector.broadcast %112 : vector<1x128xi1> to vector<16x128xi1>
    %114 = vector.shape_cast %110 : vector<16x1xf32> to vector<16x1xf32>
    %115 = vector.broadcast %114 : vector<16x1xf32> to vector<16x128xf32>
    %116 = vector.shape_cast %111 : vector<16x1xf32> to vector<16x1xf32>
    %117 = vector.broadcast %116 : vector<16x1xf32> to vector<16x128xf32>
    %118 = arith.select %113, %115, %117 : vector<16x128xi1>, vector<16x128xf32>
    %119 = vector.extract_strided_slice %70 {offsets = [1, 0], sizes = [1, 128], strides = [1, 1]} : vector<8x128xf32> to vector<1x128xf32>
    %120 = vector.broadcast %119 : vector<1x128xf32> to vector<16x128xf32>
    %121 = arith.mulf %120, %118 : vector<16x128xf32>
    %122 = vector.extract_strided_slice %75 {offsets = [0, 1], sizes = [16, 1], strides = [1, 1]} : vector<16x8xf32> to vector<16x1xf32>
    %123 = vector.extract_strided_slice %76 {offsets = [0, 1], sizes = [16, 1], strides = [1, 1]} : vector<16x8xf32> to vector<16x1xf32>
    %124 = vector.shape_cast %4 : vector<1x128xi1> to vector<1x128xi1>
    %125 = vector.broadcast %124 : vector<1x128xi1> to vector<16x128xi1>
    %126 = vector.shape_cast %122 : vector<16x1xf32> to vector<16x1xf32>
    %127 = vector.broadcast %126 : vector<16x1xf32> to vector<16x128xf32>
    %128 = vector.shape_cast %123 : vector<16x1xf32> to vector<16x1xf32>
    %129 = vector.broadcast %128 : vector<16x1xf32> to vector<16x128xf32>
    %130 = arith.select %125, %127, %129 : vector<16x128xi1>, vector<16x128xf32>
    %131 = vector.extract_strided_slice %69 {offsets = [2, 0], sizes = [1, 128], strides = [1, 1]} : vector<8x128xf32> to vector<1x128xf32>
    %132 = vector.broadcast %131 : vector<1x128xf32> to vector<16x128xf32>
    %133 = arith.mulf %132, %80 : vector<16x128xf32>
    %134 = math.exp %133 : vector<16x128xf32>
    %135 = vector.extract_strided_slice %73 {offsets = [0, 2], sizes = [16, 1], strides = [1, 1]} : vector<16x8xf32> to vector<16x1xf32>
    %136 = vector.extract_strided_slice %74 {offsets = [0, 2], sizes = [16, 1], strides = [1, 1]} : vector<16x8xf32> to vector<16x1xf32>
    %137 = vector.shape_cast %4 : vector<1x128xi1> to vector<1x128xi1>
    %138 = vector.broadcast %137 : vector<1x128xi1> to vector<16x128xi1>
    %139 = vector.shape_cast %135 : vector<16x1xf32> to vector<16x1xf32>
    %140 = vector.broadcast %139 : vector<16x1xf32> to vector<16x128xf32>
    %141 = vector.shape_cast %136 : vector<16x1xf32> to vector<16x1xf32>
    %142 = vector.broadcast %141 : vector<16x1xf32> to vector<16x128xf32>
    %143 = arith.select %138, %140, %142 : vector<16x128xi1>, vector<16x128xf32>
    %144 = vector.extract_strided_slice %70 {offsets = [2, 0], sizes = [1, 128], strides = [1, 1]} : vector<8x128xf32> to vector<1x128xf32>
    %145 = vector.broadcast %144 : vector<1x128xf32> to vector<16x128xf32>
    %146 = arith.mulf %145, %143 : vector<16x128xf32>
    %147 = vector.extract_strided_slice %75 {offsets = [0, 2], sizes = [16, 1], strides = [1, 1]} : vector<16x8xf32> to vector<16x1xf32>
    %148 = vector.extract_strided_slice %76 {offsets = [0, 2], sizes = [16, 1], strides = [1, 1]} : vector<16x8xf32> to vector<16x1xf32>
    %149 = vector.shape_cast %4 : vector<1x128xi1> to vector<1x128xi1>
    %150 = vector.broadcast %149 : vector<1x128xi1> to vector<16x128xi1>
    %151 = vector.shape_cast %147 : vector<16x1xf32> to vector<16x1xf32>
    %152 = vector.broadcast %151 : vector<16x1xf32> to vector<16x128xf32>
    %153 = vector.shape_cast %148 : vector<16x1xf32> to vector<16x1xf32>
    %154 = vector.broadcast %153 : vector<16x1xf32> to vector<16x128xf32>
    %155 = arith.select %150, %152, %154 : vector<16x128xi1>, vector<16x128xf32>
    %156 = vector.extract_strided_slice %69 {offsets = [3, 0], sizes = [1, 128], strides = [1, 1]} : vector<8x128xf32> to vector<1x128xf32>
    %157 = vector.broadcast %156 : vector<1x128xf32> to vector<16x128xf32>
    %158 = arith.mulf %157, %80 : vector<16x128xf32>
    %159 = math.exp %158 : vector<16x128xf32>
    %160 = vector.extract_strided_slice %73 {offsets = [0, 3], sizes = [16, 1], strides = [1, 1]} : vector<16x8xf32> to vector<16x1xf32>
    %161 = vector.extract_strided_slice %74 {offsets = [0, 3], sizes = [16, 1], strides = [1, 1]} : vector<16x8xf32> to vector<16x1xf32>
    %162 = vector.shape_cast %4 : vector<1x128xi1> to vector<1x128xi1>
    %163 = vector.broadcast %162 : vector<1x128xi1> to vector<16x128xi1>
    %164 = vector.shape_cast %160 : vector<16x1xf32> to vector<16x1xf32>
    %165 = vector.broadcast %164 : vector<16x1xf32> to vector<16x128xf32>
    %166 = vector.shape_cast %161 : vector<16x1xf32> to vector<16x1xf32>
    %167 = vector.broadcast %166 : vector<16x1xf32> to vector<16x128xf32>
    %168 = arith.select %163, %165, %167 : vector<16x128xi1>, vector<16x128xf32>
    %169 = vector.extract_strided_slice %70 {offsets = [3, 0], sizes = [1, 128], strides = [1, 1]} : vector<8x128xf32> to vector<1x128xf32>
    %170 = vector.broadcast %169 : vector<1x128xf32> to vector<16x128xf32>
    %171 = arith.mulf %170, %168 : vector<16x128xf32>
    %172 = vector.extract_strided_slice %75 {offsets = [0, 3], sizes = [16, 1], strides = [1, 1]} : vector<16x8xf32> to vector<16x1xf32>
    %173 = vector.extract_strided_slice %76 {offsets = [0, 3], sizes = [16, 1], strides = [1, 1]} : vector<16x8xf32> to vector<16x1xf32>
    %174 = vector.shape_cast %4 : vector<1x128xi1> to vector<1x128xi1>
    %175 = vector.broadcast %174 : vector<1x128xi1> to vector<16x128xi1>
    %176 = vector.shape_cast %172 : vector<16x1xf32> to vector<16x1xf32>
    %177 = vector.broadcast %176 : vector<16x1xf32> to vector<16x128xf32>
    %178 = vector.shape_cast %173 : vector<16x1xf32> to vector<16x1xf32>
    %179 = vector.broadcast %178 : vector<16x1xf32> to vector<16x128xf32>
    %180 = arith.select %175, %177, %179 : vector<16x128xi1>, vector<16x128xf32>
    %181 = vector.extract_strided_slice %69 {offsets = [4, 0], sizes = [1, 128], strides = [1, 1]} : vector<8x128xf32> to vector<1x128xf32>
    %182 = vector.broadcast %181 : vector<1x128xf32> to vector<16x128xf32>
    %183 = arith.mulf %182, %80 : vector<16x128xf32>
    %184 = math.exp %183 : vector<16x128xf32>
    %185 = vector.extract_strided_slice %73 {offsets = [0, 4], sizes = [16, 1], strides = [1, 1]} : vector<16x8xf32> to vector<16x1xf32>
    %186 = vector.extract_strided_slice %74 {offsets = [0, 4], sizes = [16, 1], strides = [1, 1]} : vector<16x8xf32> to vector<16x1xf32>
    %187 = vector.shape_cast %4 : vector<1x128xi1> to vector<1x128xi1>
    %188 = vector.broadcast %187 : vector<1x128xi1> to vector<16x128xi1>
    %189 = vector.shape_cast %185 : vector<16x1xf32> to vector<16x1xf32>
    %190 = vector.broadcast %189 : vector<16x1xf32> to vector<16x128xf32>
    %191 = vector.shape_cast %186 : vector<16x1xf32> to vector<16x1xf32>
    %192 = vector.broadcast %191 : vector<16x1xf32> to vector<16x128xf32>
    %193 = arith.select %188, %190, %192 : vector<16x128xi1>, vector<16x128xf32>
    %194 = vector.extract_strided_slice %70 {offsets = [4, 0], sizes = [1, 128], strides = [1, 1]} : vector<8x128xf32> to vector<1x128xf32>
    %195 = vector.broadcast %194 : vector<1x128xf32> to vector<16x128xf32>
    %196 = arith.mulf %195, %193 : vector<16x128xf32>
    %197 = vector.extract_strided_slice %75 {offsets = [0, 4], sizes = [16, 1], strides = [1, 1]} : vector<16x8xf32> to vector<16x1xf32>
    %198 = vector.extract_strided_slice %76 {offsets = [0, 4], sizes = [16, 1], strides = [1, 1]} : vector<16x8xf32> to vector<16x1xf32>
    %199 = vector.shape_cast %4 : vector<1x128xi1> to vector<1x128xi1>
    %200 = vector.broadcast %199 : vector<1x128xi1> to vector<16x128xi1>
    %201 = vector.shape_cast %197 : vector<16x1xf32> to vector<16x1xf32>
    %202 = vector.broadcast %201 : vector<16x1xf32> to vector<16x128xf32>
    %203 = vector.shape_cast %198 : vector<16x1xf32> to vector<16x1xf32>
    %204 = vector.broadcast %203 : vector<16x1xf32> to vector<16x128xf32>
    %205 = arith.select %200, %202, %204 : vector<16x128xi1>, vector<16x128xf32>
    %206 = vector.extract_strided_slice %69 {offsets = [5, 0], sizes = [1, 128], strides = [1, 1]} : vector<8x128xf32> to vector<1x128xf32>
    %207 = vector.broadcast %206 : vector<1x128xf32> to vector<16x128xf32>
    %208 = arith.mulf %207, %80 : vector<16x128xf32>
    %209 = math.exp %208 : vector<16x128xf32>
    %210 = vector.extract_strided_slice %73 {offsets = [0, 5], sizes = [16, 1], strides = [1, 1]} : vector<16x8xf32> to vector<16x1xf32>
    %211 = vector.extract_strided_slice %74 {offsets = [0, 5], sizes = [16, 1], strides = [1, 1]} : vector<16x8xf32> to vector<16x1xf32>
    %212 = vector.shape_cast %4 : vector<1x128xi1> to vector<1x128xi1>
    %213 = vector.broadcast %212 : vector<1x128xi1> to vector<16x128xi1>
    %214 = vector.shape_cast %210 : vector<16x1xf32> to vector<16x1xf32>
    %215 = vector.broadcast %214 : vector<16x1xf32> to vector<16x128xf32>
    %216 = vector.shape_cast %211 : vector<16x1xf32> to vector<16x1xf32>
    %217 = vector.broadcast %216 : vector<16x1xf32> to vector<16x128xf32>
    %218 = arith.select %213, %215, %217 : vector<16x128xi1>, vector<16x128xf32>
    %219 = vector.extract_strided_slice %70 {offsets = [5, 0], sizes = [1, 128], strides = [1, 1]} : vector<8x128xf32> to vector<1x128xf32>
    %220 = vector.broadcast %219 : vector<1x128xf32> to vector<16x128xf32>
    %221 = arith.mulf %220, %218 : vector<16x128xf32>
    %222 = vector.extract_strided_slice %75 {offsets = [0, 5], sizes = [16, 1], strides = [1, 1]} : vector<16x8xf32> to vector<16x1xf32>
    %223 = vector.extract_strided_slice %76 {offsets = [0, 5], sizes = [16, 1], strides = [1, 1]} : vector<16x8xf32> to vector<16x1xf32>
    %224 = vector.shape_cast %4 : vector<1x128xi1> to vector<1x128xi1>
    %225 = vector.broadcast %224 : vector<1x128xi1> to vector<16x128xi1>
    %226 = vector.shape_cast %222 : vector<16x1xf32> to vector<16x1xf32>
    %227 = vector.broadcast %226 : vector<16x1xf32> to vector<16x128xf32>
    %228 = vector.shape_cast %223 : vector<16x1xf32> to vector<16x1xf32>
    %229 = vector.broadcast %228 : vector<16x1xf32> to vector<16x128xf32>
    %230 = arith.select %225, %227, %229 : vector<16x128xi1>, vector<16x128xf32>
    %231 = vector.extract_strided_slice %69 {offsets = [6, 0], sizes = [1, 128], strides = [1, 1]} : vector<8x128xf32> to vector<1x128xf32>
    %232 = vector.broadcast %231 : vector<1x128xf32> to vector<16x128xf32>
    %233 = arith.mulf %232, %80 : vector<16x128xf32>
    %234 = math.exp %233 : vector<16x128xf32>
    %235 = vector.extract_strided_slice %73 {offsets = [0, 6], sizes = [16, 1], strides = [1, 1]} : vector<16x8xf32> to vector<16x1xf32>
    %236 = vector.extract_strided_slice %74 {offsets = [0, 6], sizes = [16, 1], strides = [1, 1]} : vector<16x8xf32> to vector<16x1xf32>
    %237 = vector.shape_cast %4 : vector<1x128xi1> to vector<1x128xi1>
    %238 = vector.broadcast %237 : vector<1x128xi1> to vector<16x128xi1>
    %239 = vector.shape_cast %235 : vector<16x1xf32> to vector<16x1xf32>
    %240 = vector.broadcast %239 : vector<16x1xf32> to vector<16x128xf32>
    %241 = vector.shape_cast %236 : vector<16x1xf32> to vector<16x1xf32>
    %242 = vector.broadcast %241 : vector<16x1xf32> to vector<16x128xf32>
    %243 = arith.select %238, %240, %242 : vector<16x128xi1>, vector<16x128xf32>
    %244 = vector.extract_strided_slice %70 {offsets = [6, 0], sizes = [1, 128], strides = [1, 1]} : vector<8x128xf32> to vector<1x128xf32>
    %245 = vector.broadcast %244 : vector<1x128xf32> to vector<16x128xf32>
    %246 = arith.mulf %245, %243 : vector<16x128xf32>
    %247 = vector.extract_strided_slice %75 {offsets = [0, 6], sizes = [16, 1], strides = [1, 1]} : vector<16x8xf32> to vector<16x1xf32>
    %248 = vector.extract_strided_slice %76 {offsets = [0, 6], sizes = [16, 1], strides = [1, 1]} : vector<16x8xf32> to vector<16x1xf32>
    %249 = vector.shape_cast %4 : vector<1x128xi1> to vector<1x128xi1>
    %250 = vector.broadcast %249 : vector<1x128xi1> to vector<16x128xi1>
    %251 = vector.shape_cast %247 : vector<16x1xf32> to vector<16x1xf32>
    %252 = vector.broadcast %251 : vector<16x1xf32> to vector<16x128xf32>
    %253 = vector.shape_cast %248 : vector<16x1xf32> to vector<16x1xf32>
    %254 = vector.broadcast %253 : vector<16x1xf32> to vector<16x128xf32>
    %255 = arith.select %250, %252, %254 : vector<16x128xi1>, vector<16x128xf32>
    %256 = vector.extract_strided_slice %69 {offsets = [7, 0], sizes = [1, 128], strides = [1, 1]} : vector<8x128xf32> to vector<1x128xf32>
    %257 = vector.broadcast %256 : vector<1x128xf32> to vector<16x128xf32>
    %258 = arith.mulf %257, %80 : vector<16x128xf32>
    %259 = math.exp %258 : vector<16x128xf32>
    %260 = vector.extract_strided_slice %73 {offsets = [0, 7], sizes = [16, 1], strides = [1, 1]} : vector<16x8xf32> to vector<16x1xf32>
    %261 = vector.extract_strided_slice %74 {offsets = [0, 7], sizes = [16, 1], strides = [1, 1]} : vector<16x8xf32> to vector<16x1xf32>
    %262 = vector.shape_cast %4 : vector<1x128xi1> to vector<1x128xi1>
    %263 = vector.broadcast %262 : vector<1x128xi1> to vector<16x128xi1>
    %264 = vector.shape_cast %260 : vector<16x1xf32> to vector<16x1xf32>
    %265 = vector.broadcast %264 : vector<16x1xf32> to vector<16x128xf32>
    %266 = vector.shape_cast %261 : vector<16x1xf32> to vector<16x1xf32>
    %267 = vector.broadcast %266 : vector<16x1xf32> to vector<16x128xf32>
    %268 = arith.select %263, %265, %267 : vector<16x128xi1>, vector<16x128xf32>
    %269 = vector.extract_strided_slice %70 {offsets = [7, 0], sizes = [1, 128], strides = [1, 1]} : vector<8x128xf32> to vector<1x128xf32>
    %270 = vector.broadcast %269 : vector<1x128xf32> to vector<16x128xf32>
    %271 = arith.mulf %270, %268 : vector<16x128xf32>
    %272 = vector.extract_strided_slice %75 {offsets = [0, 7], sizes = [16, 1], strides = [1, 1]} : vector<16x8xf32> to vector<16x1xf32>
    %273 = vector.extract_strided_slice %76 {offsets = [0, 7], sizes = [16, 1], strides = [1, 1]} : vector<16x8xf32> to vector<16x1xf32>
    %274 = vector.shape_cast %4 : vector<1x128xi1> to vector<1x128xi1>
    %275 = vector.broadcast %274 : vector<1x128xi1> to vector<16x128xi1>
    %276 = vector.shape_cast %272 : vector<16x1xf32> to vector<16x1xf32>
    %277 = vector.broadcast %276 : vector<16x1xf32> to vector<16x128xf32>
    %278 = vector.shape_cast %273 : vector<16x1xf32> to vector<16x1xf32>
    %279 = vector.broadcast %278 : vector<16x1xf32> to vector<16x128xf32>
    %280 = arith.select %275, %277, %279 : vector<16x128xi1>, vector<16x128xf32>
    %cst_28 = arith.constant 0.000000e+00 : f32
    %281 = vector.broadcast %cst_28 : f32 to vector<16x128xf32>
    %282 = arith.mulf %84, %281 : vector<16x128xf32>
    %283 = arith.addf %282, %96 : vector<16x128xf32>
    %284 = arith.mulf %109, %283 : vector<16x128xf32>
    %285 = arith.addf %284, %121 : vector<16x128xf32>
    %286 = arith.mulf %134, %285 : vector<16x128xf32>
    %287 = arith.addf %286, %146 : vector<16x128xf32>
    %288 = arith.mulf %159, %287 : vector<16x128xf32>
    %289 = arith.addf %288, %171 : vector<16x128xf32>
    %290 = arith.mulf %184, %289 : vector<16x128xf32>
    %291 = arith.addf %290, %196 : vector<16x128xf32>
    %292 = arith.mulf %209, %291 : vector<16x128xf32>
    %293 = arith.addf %292, %221 : vector<16x128xf32>
    %294 = arith.mulf %234, %293 : vector<16x128xf32>
    %295 = arith.addf %294, %246 : vector<16x128xf32>
    %296 = arith.mulf %259, %295 : vector<16x128xf32>
    %297 = arith.addf %296, %271 : vector<16x128xf32>
    %298 = arith.mulf %283, %105 : vector<16x128xf32>
    %cst_29 = arith.constant dense<0.000000e+00> : vector<128xf32>
    %299 = vector.multi_reduction <add>, %298, %cst_29 [0] : vector<16x128xf32> to vector<128xf32>
    %300 = vector.shape_cast %299 : vector<128xf32> to vector<1x128xf32>
    %301 = arith.mulf %285, %130 : vector<16x128xf32>
    %cst_30 = arith.constant dense<0.000000e+00> : vector<128xf32>
    %302 = vector.multi_reduction <add>, %301, %cst_30 [0] : vector<16x128xf32> to vector<128xf32>
    %303 = vector.shape_cast %302 : vector<128xf32> to vector<1x128xf32>
    %304 = arith.mulf %287, %155 : vector<16x128xf32>
    %cst_31 = arith.constant dense<0.000000e+00> : vector<128xf32>
    %305 = vector.multi_reduction <add>, %304, %cst_31 [0] : vector<16x128xf32> to vector<128xf32>
    %306 = vector.shape_cast %305 : vector<128xf32> to vector<1x128xf32>
    %307 = arith.mulf %289, %180 : vector<16x128xf32>
    %cst_32 = arith.constant dense<0.000000e+00> : vector<128xf32>
    %308 = vector.multi_reduction <add>, %307, %cst_32 [0] : vector<16x128xf32> to vector<128xf32>
    %309 = vector.shape_cast %308 : vector<128xf32> to vector<1x128xf32>
    %310 = arith.mulf %291, %205 : vector<16x128xf32>
    %cst_33 = arith.constant dense<0.000000e+00> : vector<128xf32>
    %311 = vector.multi_reduction <add>, %310, %cst_33 [0] : vector<16x128xf32> to vector<128xf32>
    %312 = vector.shape_cast %311 : vector<128xf32> to vector<1x128xf32>
    %313 = arith.mulf %293, %230 : vector<16x128xf32>
    %cst_34 = arith.constant dense<0.000000e+00> : vector<128xf32>
    %314 = vector.multi_reduction <add>, %313, %cst_34 [0] : vector<16x128xf32> to vector<128xf32>
    %315 = vector.shape_cast %314 : vector<128xf32> to vector<1x128xf32>
    %316 = arith.mulf %295, %255 : vector<16x128xf32>
    %cst_35 = arith.constant dense<0.000000e+00> : vector<128xf32>
    %317 = vector.multi_reduction <add>, %316, %cst_35 [0] : vector<16x128xf32> to vector<128xf32>
    %318 = vector.shape_cast %317 : vector<128xf32> to vector<1x128xf32>
    %319 = arith.mulf %297, %280 : vector<16x128xf32>
    %cst_36 = arith.constant dense<0.000000e+00> : vector<128xf32>
    %320 = vector.multi_reduction <add>, %319, %cst_36 [0] : vector<16x128xf32> to vector<128xf32>
    %321 = vector.shape_cast %320 : vector<128xf32> to vector<1x128xf32>
    %322 = tpu.concatenate %300, %303, %306, %309, %312, %315, %318, %321 in 0 : vector<1x128xf32>, vector<1x128xf32>, vector<1x128xf32>, vector<1x128xf32>, vector<1x128xf32>, vector<1x128xf32>, vector<1x128xf32>, vector<1x128xf32> -> vector<8x128xf32>
    %c0_37 = arith.constant 0 : index
    %c0_38 = arith.constant 0 : index
    %323 = vector.load %arg9[%c0_37, %c0_38] : memref<1x128xf32, #tpu.memory_space<vmem>>, vector<1x128xf32>
    %324 = vector.broadcast %323 : vector<1x128xf32> to vector<8x128xf32>
    %325 = arith.mulf %54, %324 : vector<8x128xf32>
    %326 = arith.addf %322, %325 : vector<8x128xf32>
    %cst_39 = arith.constant dense<0.000000e+00> : vector<8x128xf32>
    %327 = tpu.matmul %11, %326, %cst_39 {dimension_numbers = #tpu.dot_dimension_numbers<[1], [0], [0], [1], [0, 0, 1, 1], [], []>} : vector<8x8xf32>, vector<8x128xf32>, vector<8x128xf32> -> vector<8x128xf32>
    %328 = vector.shape_cast %4 : vector<1x128xi1> to vector<1x128xi1>
    %329 = vector.broadcast %328 : vector<1x128xi1> to vector<8x128xi1>
    %330 = arith.select %329, %326, %327 : vector<8x128xi1>, vector<8x128xf32>
    %cst_40 = arith.constant 5.000000e-01 : f32
    %331 = vector.broadcast %cst_40 : f32 to vector<8x128xf32>
    %332 = arith.mulf %331, %19 : vector<8x128xf32>
    %333 = math.tanh %332 : vector<8x128xf32>
    %cst_41 = arith.constant 1.000000e+00 : f32
    %334 = vector.broadcast %cst_41 : f32 to vector<8x128xf32>
    %335 = arith.addf %333, %334 : vector<8x128xf32>
    %cst_42 = arith.constant 5.000000e-01 : f32
    %336 = vector.broadcast %cst_42 : f32 to vector<8x128xf32>
    %337 = arith.mulf %336, %335 : vector<8x128xf32>
    %338 = arith.mulf %19, %337 : vector<8x128xf32>
    %339 = arith.mulf %330, %338 : vector<8x128xf32>
    %c0_43 = arith.constant 0 : index
    %c0_44 = arith.constant 0 : index
    %340 = vector.load %arg10[%c0_43, %c0_44] : memref<128x32xf32, #tpu.memory_space<vmem>>, vector<128x32xf32>
    %cst_45 = arith.constant dense<0.000000e+00> : vector<8x32xf32>
    %341 = tpu.matmul %339, %340, %cst_45 {dimension_numbers = #tpu.dot_dimension_numbers<[1], [0], [0], [1], [0, 0, 1, 1], [], []>} : vector<8x128xf32>, vector<128x32xf32>, vector<8x32xf32> -> vector<8x32xf32>
    %c0_46 = arith.constant 0 : index
    %c0_47 = arith.constant 0 : index
    %342 = vector.load %arg11[%c0_46, %c0_47] : memref<1x32xf32, #tpu.memory_space<vmem>>, vector<1x32xf32>
    %343 = vector.broadcast %342 : vector<1x32xf32> to vector<8x32xf32>
    %344 = arith.addf %341, %343 : vector<8x32xf32>
    %c0_48 = arith.constant 0 : index
    %c0_49 = arith.constant 0 : index
    %c0_50 = arith.constant 0 : index
    %345 = vector.load %arg12[%c0_48, %c0_49, %c0_50] : memref<1x8x32xf32, #tpu.memory_space<vmem>>, vector<1x8x32xf32>
    %346 = vector.shape_cast %345 : vector<1x8x32xf32> to vector<8x32xf32>
    %347 = vector.shape_cast %344 : vector<8x32xf32> to vector<1x8x32xf32>
    tpu.vector_store %arg12[%c0_48, %c0_49, %c0_50], %347 {strides = array<i32>} : memref<1x8x32xf32, #tpu.memory_space<vmem>>, vector<1x8x32xf32>,
    return
  }
  func.func @transform_0(%arg0: i32) -> (i32, i32, i32) {
    %c0_i32 = arith.constant 0 : i32
    %c0_i32_0 = arith.constant 0 : i32
    %c0_i32_1 = arith.constant 0 : i32
    return %arg0, %c0_i32, %c0_i32_0 : i32, i32, i32
  }
  func.func @transform_1(%arg0: i32) -> (i32, i32) {
    %c0_i32 = arith.constant 0 : i32
    %c0_i32_0 = arith.constant 0 : i32
    %c0_i32_1 = arith.constant 0 : i32
    return %c0_i32, %c0_i32_0 : i32, i32
  }
  func.func @transform_2(%arg0: i32) -> (i32, i32) {
    %c0_i32 = arith.constant 0 : i32
    %c0_i32_0 = arith.constant 0 : i32
    %c0_i32_1 = arith.constant 0 : i32
    return %c0_i32, %c0_i32_0 : i32, i32
  }
  func.func @transform_3(%arg0: i32) -> (i32, i32) {
    %c0_i32 = arith.constant 0 : i32
    %c0_i32_0 = arith.constant 0 : i32
    %c0_i32_1 = arith.constant 0 : i32
    return %c0_i32, %c0_i32_0 : i32, i32
  }
  func.func @transform_4(%arg0: i32) -> (i32, i32) {
    %c0_i32 = arith.constant 0 : i32
    %c0_i32_0 = arith.constant 0 : i32
    %c0_i32_1 = arith.constant 0 : i32
    return %c0_i32, %c0_i32_0 : i32, i32
  }
  func.func @transform_5(%arg0: i32) -> (i32, i32) {
    %c0_i32 = arith.constant 0 : i32
    %c0_i32_0 = arith.constant 0 : i32
    %c0_i32_1 = arith.constant 0 : i32
    return %c0_i32, %c0_i32_0 : i32, i32
  }
  func.func @transform_6(%arg0: i32) -> (i32, i32) {
    %c0_i32 = arith.constant 0 : i32
    %c0_i32_0 = arith.constant 0 : i32
    %c0_i32_1 = arith.constant 0 : i32
    return %c0_i32, %c0_i32_0 : i32, i32
  }
  func.func @transform_7(%arg0: i32) -> (i32, i32) {
    %c0_i32 = arith.constant 0 : i32
    %c0_i32_0 = arith.constant 0 : i32
    %c0_i32_1 = arith.constant 0 : i32
    return %c0_i32, %c0_i32_0 : i32, i32
  }
  func.func @transform_8(%arg0: i32) -> (i32, i32) {
    %c0_i32 = arith.constant 0 : i32
    %c0_i32_0 = arith.constant 0 : i32
    %c0_i32_1 = arith.constant 0 : i32
    return %c0_i32, %c0_i32_0 : i32, i32
  }
  func.func @transform_9(%arg0: i32) -> (i32, i32) {
    %c0_i32 = arith.constant 0 : i32
    %c0_i32_0 = arith.constant 0 : i32
    %c0_i32_1 = arith.constant 0 : i32
    return %c0_i32, %c0_i32_0 : i32, i32
  }
  func.func @transform_10(%arg0: i32) -> (i32, i32) {
    %c0_i32 = arith.constant 0 : i32
    %c0_i32_0 = arith.constant 0 : i32
    %c0_i32_1 = arith.constant 0 : i32
    return %c0_i32, %c0_i32_0 : i32, i32
  }
  func.func @transform_11(%arg0: i32) -> (i32, i32, i32) {
    %c0_i32 = arith.constant 0 : i32
    %c0_i32_0 = arith.constant 0 : i32
    %c0_i32_1 = arith.constant 0 : i32
    return %arg0, %c0_i32, %c0_i32_0 : i32, i32, i32
  }
}

</mosaic_0001>

<bundles_post_ra>
// kernel: bidirectional_mamba.1
= control target key start
LH: loop header
LB: loop body
LE: loop exit
PB: predicated region body
PF: predicated region fallthrough
CT: control target
= control target key end

     0   :  { %s2837_s0 = inlined_call_operand.vmem [shape: f32[2,8,32], index: 0, kind: input, shape index: {}]   ;;  %s2838_s1 = inlined_call_operand.vmem [shape: f32[32,256], index: 1, kind: input, shape index: {}]   ;;  %s2839_s2 = inlined_call_operand.vmem [shape: f32[4,128], index: 2, kind: input, shape index: {}]   ;;  %s2840_s3 = inlined_call_operand.vmem [shape: f32[1,128], index: 3, kind: input, shape index: {}]   ;;  %s2841_s4 = inlined_call_operand.vmem [shape: f32[128,128], index: 4, kind: input, shape index: {}]   ;;  %s2842_s5 = inlined_call_operand.vmem [shape: f32[1,128], index: 5, kind: input, shape index: {}]   ;;  %s2843_s6 = inlined_call_operand.vmem [shape: f32[64,128], index: 6, kind: input, shape index: {}]   ;;  %s2844_s7 = inlined_call_operand.vmem [shape: f32[16,128], index: 7, kind: input, shape index: {}]   ;;  %s2845_s8 = inlined_call_operand.vmem [shape: f32[1,128], index: 8, kind: input, shape index: {}]   ;;  %s2846_s9 = inlined_call_operand.vmem [shape: f32[128,32], index: 9, kind: input, shape index: {}]   ;;  %s2847_s10 = inlined_call_operand.vmem [shape: f32[1,32], index: 10, kind: input, shape index: {}]   ;;  %s2848_s11 = inlined_call_operand.hbm [shape: f32[2,8,32], index: 11, kind: output, shape index: {}]  }
   0x1   :  { %2849 = sst [smem:[#allocation6_spill]] %s2837_s0 }
   0x2   :  { %16 = vsyncpa [#allocation3], 0 }
   0x3   :  { %18 = vsyncpa [#allocation3 + $0x1], 0  ;;  %s2083_s17 = smov 0   ;;  %s2085_s18 = smov 0  }
   0x4   :  { %s2087_s19 = smov 0   ;;  %s2089_s20 = smov 0  }
   0x5 LB: > { %s2104_s21 = sadd.s32 4294967295, %s2010_s20   ;;  %s1634_s22 = sadd.s32 4294967294, %s2010_s20   ;;  %s2010_s20 = sphi %s2089_s20, %s2858_s20   ;;  %s2006_s19 = sphi %s2087_s19, %s2857_s19   ;;  %s2002_s18 = sphi %s2085_s18, %s2856_s18   ;;  %s1998_s17 = sphi %s2083_s17, %s2855_s17  }
   0x6   : > { %s2108_s23 = sadd.s32 1, %s2010_s20   ;;  %s267_s24 = sadd.s32 1, %s2006_s19 }
   0x7   : > { %s264_s25 = ssub.s32 %s2010_s20, %s2108_s23  ;;  %p277_p0 = scmp.ne.s32.totalorder %s2006_s19, %s2002_s18 }
   0x8   : > { %p265_p1 = scmp.eq.s32.totalorder %s264_s25, 0  ;;  %p278_p2 = scmp.eq.s32.totalorder %s2104_s21, 1 }
   0x9   : > { %p283_p3 = scmp.ne.s32.totalorder %s2002_s18, %s1998_s17  ;;  %p284_p4 = scmp.eq.s32.totalorder %s1634_s22, 1 }
   0xa   : > { %s2119_s26 = scalar_select %p265_p1, %s2006_s19, %s267_s24  }
   0xb   : > { %p2121_p5 = por %p278_p2, %p277_p0  ;;  %p2125_p6 = por %p284_p4, %p283_p3 }
   0xc   : > { %2850 = sst [smem:[#allocation5_spill]] %s2119_s26  ;;  %p1637_p7 = scmp.ge.s32.totalorder %s2010_s20, 1 }
   0xd   : > { %p339_p8 = scmp.lt.s32.totalorder %s2010_s20, 3 }
   0xf   : > { %p340_p9 = pnand %p1637_p7, %p339_p8 }
  0x10   : > { %p378_p10 = scmp.lt.s32.totalorder (!%p340_p9), %s2104_s21, 1  ;;  %s2853_s0 = sld [smem:[#allocation6_spill]] (!%p340_p9) }
  0x11   : > { %343 = sbr.rel (%p340_p9) target bundleno = 1391 (0x56f), region = 64  ;;  %s375_s13 = sand.u32 (!%p340_p9), 1, %s2002_s18  }
  0x12   : > { %s1638_s14 = sshll.u32 (!%p340_p9), %s375_s13, 3  ;;  %s1649_s22 = sshll.u32 (!%p340_p9), %s2104_s21, 7 }
  0x13   : > { %s377_s24 = scalar_lea.vmem (!%p340_p9), [#allocation2], %s1638_s14  ;;  %s2801_s30 = scalar_lea.hbm (!%p340_p9), %s2848_s11, %s1649_s22 }
  0x14   : > { %s1575_s25 = sshll.u32 (!%p340_p9), %s377_s24, 4  ;;  %s1562_s12 = scalar_lea.sflag (!%p340_p9), [#allocation3], %s375_s13  ;;  %s1576_s25 = int_to_ptr.vmem [resolvable:$true] %s1575_s25 }
  0x16   : > { %v399_v0 = vld [vmem:[%s2838_s1 + $0x38] sm:$0xff]  ;;  %v398_v1 = vld [vmem:[%s2838_s1 + $0x30] sm:$0xff]  ;;  %v397_v2 = vld [vmem:[%s2838_s1 + $0x28] sm:$0xff]  ;;  %v2012_v4 = vmov 0.0   ;;  %s379_s29 = scalar_select %p378_p10, %s2104_s21, 1  ;;  %vm400_vm0 = vcmask 261120   ;;  %v383_v10 = vlaneseq }
  0x17   : > { %428 = vmatprep.subr.mxu0 %v399_v0  ;;  %v396_v3 = vld [vmem:[%s2838_s1 + $0x20] sm:$0xff]  ;;  %468 = vmatprep.mubr.f32.mxu0 %v2012_v4  ;;  %v395_v5 = vld [vmem:[%s2838_s1 + $0x18] sm:$0xff]  ;;  %v394_v6 = vld [vmem:[%s2838_s1 + $0x10] sm:$0xff]  ;;  %vm2013_vm1 = vmmov 0   ;;  %vm475_vm3 = vcmask 64512   ;;  %vm555_vm5 = vcmask 1042432  }
  0x18   : > { %429 = vmatpush1.msra.mxu0 %v398_v1  ;;  %1699 = vmatprep.subr.mxu1 %v2012_v4  ;;  %v393_v7 = vld [vmem:[%s2838_s1 + $0x8] sm:$0xff]  ;;  %s1639_s15 = sshll.u32 %s379_s29, 3  ;;  %v392_v8 = vld [vmem:[%s2838_s1] sm:$0xff]  ;;  %v2165_v11 = vand.u32 127, %v383_v10  ;;  %v2167_v12 = vshrl.u32 %v383_v10, 7  ;;  %v634_v16 = vld [vmem:[%s2841_s4 + $0x78] sm:$0xff] }
  0x19   : > { %430 = vmatprep.subr.mxu0 %v397_v2  ;;  %s381_s26 = scalar_lea.vmem %s2853_s0, %s1639_s15  ;;  %1701 = vmatprep.mubr.msk.f32.mxu1 %vm2013_vm1, %v2012_v4  ;;  %v633_v17 = vld [vmem:[%s2841_s4 + $0x70] sm:$0xff]  ;;  %v632_v18 = vld [vmem:[%s2841_s4 + $0x68] sm:$0xff]  ;;  %v631_v19 = vld [vmem:[%s2841_s4 + $0x60] sm:$0xff]  ;;  %vm580_vm6 = vcmask 1046528   ;;  %vm594_vm7 = vcmask 1045504   ;;  %vm608_vm8 = vcmask 1044480  }
  0x1a   : > { %431 = vmatpush1.msra.mxu0 %v396_v3  ;;  %v382_v9 = vld [vmem:[%s381_s26] sm:$0xff]  ;;  %v388_v13 = vadd.s32 %v2167_v12, %v2165_v11  ;;  %v630_v20 = vld [vmem:[%s2841_s4 + $0x58] sm:$0xff]  ;;  %v629_v21 = vld [vmem:[%s2841_s4 + $0x50] sm:$0xff]  ;;  %v2250_v33 = vsub.s32 1, %v2167_v12  ;;  %v2253_v34 = vsub.s32 2, %v2167_v12  ;;  %v2256_v35 = vsub.s32 3, %v2167_v12 }
  0x1b   : > { %432 = vmatprep.subr.mxu0 %v395_v5  ;;  %v628_v22 = vld [vmem:[%s2841_s4 + $0x48] sm:$0xff]  ;;  %v627_v23 = vld [vmem:[%s2841_s4 + $0x40] sm:$0xff]  ;;  %v626_v24 = vld [vmem:[%s2841_s4 + $0x38] sm:$0xff]  ;;  %v2262_v37 = vsub.s32 0, %v2167_v12  ;;  %vm385_vm4 = vcmp.lt.s32.totalorder %v2165_v11, 64  ;;  %vm1371_vm9 = vcmask 1040384  }
  0x1c   : > { %433 = vmatpush1.msra.mxu0 %v394_v6  ;;  %vm389_vm2 = vcmp.eq.s32.totalorder %v388_v13, 7  ;;  %v625_v25 = vld [vmem:[%s2841_s4 + $0x30] sm:$0xff]  ;;  %v624_v26 = vld [vmem:[%s2841_s4 + $0x28] sm:$0xff]  ;;  %v623_v27 = vld [vmem:[%s2841_s4 + $0x20] sm:$0xff]  ;;  %vm1373_vm10 = vcmask 1041408   ;;  %vm1376_vm11 = vcmask 1043456  }
  0x1d   : > { %434 = vmatprep.subr.mxu0 %v393_v7  ;;  %v2172_v14 = vsel %vm389_vm2, 1.0, %v2012_v4  ;;  %v622_v28 = vld [vmem:[%s2841_s4 + $0x18] sm:$0xff]  ;;  %v621_v29 = vld [vmem:[%s2841_s4 + $0x10] sm:$0xff]  ;;  %v620_v30 = vld [vmem:[%s2841_s4 + $0x8] sm:$0xff]  ;;  %s1950_s0 = scalar_lea.vmem %s1576_s25, 128  ;;  %s2022_s21 = smov [#allocation2]  }
  0x1e   : > { %435 = vmatpush1.msra.mxu0 %v392_v8  ;;  %v619_v31 = vld [vmem:[%s2841_s4] sm:$0xff]  ;;  %v723_v10 = vld [vmem:[%s2843_s6 + $0x8] sm:$0xff]  ;;  %v724_v13 = vld [vmem:[%s2843_s6 + $0x10] sm:$0xff]  ;;  %p1951_p11 = scmp.ne.s32.totalorder %s1576_s25, %s1950_s0  ;;  %s1954_s14 = sshll.u32 %s2022_s21, 4  ;;  %s1955_s14 = int_to_ptr.vmem [resolvable:$false] %s1954_s14 }
  0x1f   : > { %1641 = vmatmul.mubr.msk.f32.vlgmr.msra.gmra.mxu0 %vm400_vm0, %v382_v9  ;;  %v722_v32 = vld [vmem:[%s2843_s6] sm:$0xff]  ;;  %s1956_s15 = scalar_lea.vmem %s1955_s14, 256  ;;  %p1957_p0 = scmp.lt.s32.totalorder %s1576_s25, %s1955_s14 }
  0x20   : > { %1741 = vmatprep.mubr.f32.mxu0 %v722_v32  ;;  %v557_v36 = vld [vmem:[%s2839_s2] sm:$0xf]  ;;  %p1952_p12 = pnand %p1951_p11, %p2121_p5  ;;  %p1958_p1 = scmp.lt.s32.totalorder %s1956_s15, %s1950_s0 }
  0x21   : > { %v575_v39 = vrot.slane %v557_v36, %v2250_v33  ;;  %v589_v40 = vrot.slane %v557_v36, %v2253_v34  ;;  %v603_v41 = vrot.slane %v557_v36, %v2256_v35  ;;  %v569_v43 = vrot.slane %v557_v36, %v2262_v37  ;;  %v1643_v47 = vld [vmem:[%s2840_s3] ss:$0 sm:$0xff] }
  0x22   : > { %p1953_p13 = pneg %p1952_p12  ;;  %p1959_p2 = por %p1958_p1, %p1957_p0 }
  0x24   : > { %p1960_p3 = pnand %p1959_p2, %p1953_p13 }
  0xdf   : > { %v2174_v15 = vpop.f32.mrf.mxu0 }
  0xe0   : > { %1700 = vmatpush3.msra.mxu1 %v2174_v15 }
  0xe1   : > { %1702 = vmatmul.mubr.msk.f32.vlgmr.msra.gmra.mxu1 %vm475_vm3, %v2172_v14  ;;  %1704 = vmatprep.subr.mxu1 %v2012_v4 }
  0xe2   : > { %1736 = vmatprep.mubr.msk.f32.mxu1 %vm2013_vm1, %v2012_v4  ;;  %1705 = vmatpush3.msra.mxu1 %v634_v16  ;;  %v726_v16 = vld [vmem:[%s2843_s6 + $0x20] sm:$0xff] }
  0xe3   : > { %1706 = vmatprep.subr.mxu1 %v2012_v4 }
  0xe4   : > { %1707 = vmatpush3.msra.mxu1 %v633_v17  ;;  %v727_v17 = vld [vmem:[%s2843_s6 + $0x28] sm:$0xff] }
  0xe5   : > { %1708 = vmatprep.subr.mxu1 %v2012_v4 }
  0xe6   : > { %1709 = vmatpush3.msra.mxu1 %v632_v18  ;;  %v728_v18 = vld [vmem:[%s2843_s6 + $0x30] sm:$0xff] }
  0xe7   : > { %1710 = vmatprep.subr.mxu1 %v2012_v4 }
  0xe8   : > { %1711 = vmatpush3.msra.mxu1 %v631_v19  ;;  %v729_v19 = vld [vmem:[%s2843_s6 + $0x38] sm:$0xff] }
  0xe9   : > { %1712 = vmatprep.subr.mxu1 %v2012_v4 }
  0xea   : > { %1713 = vmatpush3.msra.mxu1 %v630_v20  ;;  %v2014_v20 = vmov 1  }
  0xeb   : > { %1714 = vmatprep.subr.mxu1 %v2012_v4  ;;  %1843 = vset.pattern.permute.xlu1 %v2014_v20 }
  0xec   : > { %1715 = vmatpush3.msra.mxu1 %v629_v21  ;;  %v2015_v21 = vmov 0  }
  0xed   : > { %1716 = vmatprep.subr.mxu1 %v2012_v4  ;;  %1842 = vset.pattern.permute.xlu0 %v2015_v21 }
  0xee   : > { %1717 = vmatpush3.msra.mxu1 %v628_v22 }
  0xef   : > { %1718 = vmatprep.subr.mxu1 %v2012_v4 }
  0xf0   : > { %1719 = vmatpush3.msra.mxu1 %v627_v23  ;;  %v2314_v23 = vpop.f32.mrf.mxu0 }
  0xf1   : > { %1720 = vmatprep.subr.mxu1 %v2012_v4 }
  0xf2   : > { %1721 = vmatpush3.msra.mxu1 %v626_v24 }
  0xf3   : > { %1722 = vmatprep.subr.mxu1 %v2012_v4 }
  0xf4   : > { %1723 = vmatpush3.msra.mxu1 %v625_v25 }
  0xf5   : > { %1724 = vmatprep.subr.mxu1 %v2012_v4 }
  0xf6   : > { %1725 = vmatpush3.msra.mxu1 %v624_v26  ;;  %v2016_v26 = vmov 3  }
  0xf7   : > { %1726 = vmatprep.subr.mxu1 %v2012_v4 }
  0xf8   : > { %1727 = vmatpush3.msra.mxu1 %v623_v27  ;;  %v2017_v27 = vmov 2  }
  0xf9   : > { %1728 = vmatprep.subr.mxu1 %v2012_v4 }
  0xfa   : > { %1729 = vmatpush3.msra.mxu1 %v622_v28  ;;  %v2018_v28 = vmov 5  }
  0xfb   : > { %1730 = vmatprep.subr.mxu1 %v2012_v4 }
  0xfc   : > { %1731 = vmatpush3.msra.mxu1 %v621_v29  ;;  %v2019_v29 = vmov 4  }
  0xfd   : > { %1732 = vmatprep.subr.mxu1 %v2012_v4 }
  0xfe   : > { %1733 = vmatpush3.msra.mxu1 %v620_v30  ;;  %v2020_v30 = vmov 7  }
  0xff   : > { %1734 = vmatprep.subr.mxu1 %v2012_v4 }
 0x100   : > { %1735 = vmatpush3.msra.mxu1 %v619_v31  ;;  %v2021_v31 = vmov 6  }
 0x101   : > { %1753 = vmatprep.subr.mxu1 %v2012_v4 }
 0x1a1   : > { %v545_v38 = vpop.f32.mrf.mxu1 }
 0x1a2   : > { %v551_v42 = vsel %vm385_vm4, %v2174_v15, %v545_v38  ;;  %v725_v15 = vld [vmem:[%s2843_s6 + $0x18] sm:$0xff] }
 0x1a3   : > { %v553_v44 = vrot.slane %v551_v42, 5  ;;  %v1703_v45 = vpop.f32.mrf.mxu1 }
 0x1a5   : > { %v556_v46 = vsel %vm555_vm5, 0.0, %v553_v44  ;;  %v577_v48 = vmul.f32 %v575_v39, %v553_v44  ;;  %v591_v49 = vmul.f32 %v589_v40, %v553_v44  ;;  %v605_v50 = vmul.f32 %v603_v41, %v553_v44 }
 0x1a6   : > { %v570_v51 = vmul.f32 %v569_v43, %v556_v46  ;;  %v576_v52 = vmul.f32 %v575_v39, %v556_v46  ;;  %v590_v53 = vmul.f32 %v589_v40, %v556_v46  ;;  %v604_v54 = vmul.f32 %v603_v41, %v556_v46  ;;  %v1644_v40 = vld [vmem:[%s2842_s5] ss:$0 sm:$0xff] }
 0x1a7   : > { %v582_v55 = vrot.slane %v577_v48, 1  ;;  %v596_v59 = vrot.slane %v591_v49, 2  ;;  %v610_v62 = vrot.slane %v605_v50, 3  ;;  %v836_v49 = vld [vmem:[%s2844_s7 + $0x8] sm:$0xff] }
 0x1a8   : > { %v571_v56 = vadd.f32 %v1643_v47, %v570_v51  ;;  %v581_v57 = vrot.slane %v576_v52, 1  ;;  %v595_v58 = vrot.slane %v590_v53, 2  ;;  %v609_v61 = vrot.slane %v604_v54, 3 }
 0x1a9   : > { %v839_v50 = vmul.f32 1.442695, %v836_v49  ;;  %v1165_v49 = vsub.s32 6, %v2167_v12 }
 0x1aa   : > { %v583_v60 = vsel %vm580_vm6, %v581_v57, %v582_v55  ;;  %v597_v0 = vsel %vm594_vm7, %v595_v58, %v596_v59  ;;  %v611_v2 = vsel %vm608_vm8, %v609_v61, %v610_v62 }
 0x1ab   : > { %v585_v63 = vadd.f32 %v583_v60, %v571_v56  ;;  %v835_v60 = vld [vmem:[%s2844_s7] sm:$0xff] }
 0x1ad   : > { %v599_v1 = vadd.f32 %v597_v0, %v585_v63  ;;  %v837_v63 = vmul.f32 1.442695, %v835_v60 }
 0x1af   : > { %v613_v3 = vadd.f32 %v611_v2, %v599_v1 }
 0x1b1   : > { %v614_v5 = vmul.f32 0.5, %v613_v3 }
 0x1b3   : > { %1906 = vtanh.f32 %v614_v5 }
 0x1c0   : > { %v1907_v6 = vpop.eup %1906 }
 0x1c1   : > { %v616_v7 = vadd.f32 1.0, %v1907_v6 }
 0x1c3   : > { %v617_v8 = vmul.f32 0.5, %v616_v7 }
 0x1c5   : > { %v2279_v9 = vmul.f32 %v617_v8, %v613_v3 }
 0x1c7   : > { %1737 = vmatmul.mubr.f32.vlgmr.msra.gmra.mxu1 %v2279_v9  ;;  %1739 = vmatprep.subr.mxu0 %v2279_v9 }
 0x1c8   : > { %1740 = vmatpush3.xpose.msra.mxu0 %v2279_v9  ;;  %1755 = vmatprep.mubr.msk.f32.mxu1 %vm2013_vm1, %v2012_v4 }
 0x1c9   : > { %1758 = vmatprep.subr.mxu0 %v2012_v4 }
 0x1cb   : > { %1742 = vmatmul.mubr.f32.vlgmr.msra.gmra.mxu0 %v723_v10 }
 0x1cc   : > { %1744 = vmatprep.mubr.f32.mxu0 %v724_v13 }
 0x1cf   : > { %1745 = vmatmul.mubr.f32.gmra.mxu0 %v725_v15 }
 0x1d0   : > { %1747 = vmatprep.mubr.f32.mxu0 %v726_v16 }
 0x1d3   : > { %1748 = vmatmul.mubr.f32.gmra.mxu0 %v727_v17 }
 0x1d4   : > { %1750 = vmatprep.mubr.f32.mxu0 %v728_v18 }
 0x1d7   : > { %1751 = vmatmul.mubr.f32.gmra.mxu0 %v729_v19 }
 0x1d8   : > { %1790 = vmatprep.mubr.msk.f32.mxu0 %vm2013_vm1, %v2012_v4 }
 0x287   : > { %v2312_v22 = vpop.f32.mrf.mxu1 }
 0x288   : > { %v709_v41 = vadd.f32 %v1644_v40, %v2312_v22  ;;  %v1061_v22 = vsub.s32 4, %v2167_v12 }
 0x289   : > { %v1738_v24 = vpop.f32.mrf.mxu1 }
 0x28a   : > { %v713_v42 = vand.u32 2147483647, %v709_v41  ;;  %v712_v55 = vmax.f32 %v709_v41, 0.0 }
 0x28b   : > { %v1743_v25 = vpop.f32.mrf.mxu0 }
 0x28c   : > { %918 = vperm.xlu1 %1843, %v1743_v25   ;;  %860 = vperm.xlu0 %1842, %v1743_v25   ;;  %v714_v43 = vsub.f32 0.0, %v713_v42 }
 0x28d   : > { %v796_v32 = vpop.f32.mrf.mxu0 }
 0x28e   : > { %v715_v45 = vmul.f32 1.442695, %v714_v43  ;;  %v1113_v43 = vsub.s32 5, %v2167_v12 }
 0x28f   : > { %v1746_v36 = vpop.f32.mrf.mxu0 }
 0x290   : > { %1845 = vset.pattern.permute.xlu1 %v2016_v26  ;;  %1844 = vset.pattern.permute.xlu0 %v2017_v27  ;;  %1908 = vpow2.f32 %v715_v45 }
 0x291   : > { %1022 = vperm.xlu1 %1845, %v1743_v25   ;;  %970 = vperm.xlu0 %1844, %v1743_v25   ;;  %v806_v38 = vpop.f32.mrf.mxu0 }
 0x293   : > { %v1749_v39 = vpop.f32.mrf.mxu0 }
 0x295   : > { %1847 = vset.pattern.permute.xlu1 %v2018_v28  ;;  %1846 = vset.pattern.permute.xlu0 %v2019_v29  ;;  %v816_v44 = vpop.f32.mrf.mxu0 }
 0x296   : > { %1126 = vperm.xlu1 %1847, %v1743_v25   ;;  %1074 = vperm.xlu0 %1846, %v1743_v25  }
 0x297   : > { %v1752_v47 = vpop.f32.mrf.mxu0 }
 0x29a   : > { %1849 = vset.pattern.permute.xlu1 %v2020_v30  ;;  %1848 = vset.pattern.permute.xlu0 %v2021_v31 }
 0x29b   : > { %1230 = vperm.xlu1 %1849, %v1743_v25   ;;  %1178 = vperm.xlu0 %1848, %v1743_v25  }
 0x29d   : > { %v1909_v46 = vpop.eup %1908 }
 0x29e   : > { %v717_v48 = vadd.f32 1.0, %v1909_v46 }
 0x29f   : > { %1852 = vset.pattern.permute.xlu1 %v2017_v27  ;;  %1850 = vset.pattern.permute.xlu0 %v2015_v21 }
 0x2a0   : > { %966 = vperm.xlu1 %1852, %v796_v32   ;;  %855 = vperm.xlu0 %1850, %v796_v32   ;;  %1910 = vlog2.f32 %v717_v48 }
 0x2a1   : > { %1912 = vpow2.f32 %v839_v50 }
 0x2a2   : > { %1914 = vpow2.f32 %v837_v63 }
 0x2a4   : > { %1854 = vset.pattern.permute.xlu1 %v2019_v29  ;;  %1851 = vset.pattern.permute.xlu0 %v2014_v20 }
 0x2a5   : > { %1070 = vperm.xlu1 %1854, %v796_v32   ;;  %914 = vperm.xlu0 %1851, %v796_v32  }
 0x2a9   : > { %1856 = vset.pattern.permute.xlu1 %v2021_v31  ;;  %1853 = vset.pattern.permute.xlu0 %v2016_v26 }
 0x2aa   : > { %1174 = vperm.xlu1 %1856, %v796_v32   ;;  %1018 = vperm.xlu0 %1853, %v796_v32  }
 0x2ad   : > { %v1911_v51 = vpop.eup %1910 }
 0x2ae   : > { %1858 = vset.pattern.permute.xlu1 %v2015_v21  ;;  %1855 = vset.pattern.permute.xlu0 %v2018_v28  ;;  %v719_v54 = vmul.f32 0.6931472, %v1911_v51  ;;  %v1913_v59 = vpop.eup %1912 }
 0x2af   : > { %1122 = vperm.xlu0 %1855, %v796_v32   ;;  %870 = vperm.xlu1 %1858, %v1746_v36   ;;  %v2384_v61 = vsub.f32 0.0, %v1913_v59  ;;  %v1915_v19 = vpop.eup %1914 }
 0x2b0   : > { %v2374_v56 = vadd.f32 %v719_v54, %v712_v55 }
 0x2b2   : > { %v846_v62 = vrot.slane %v2374_v56, %v2262_v37  ;;  %v906_v6 = vrot.slane %v2374_v56, %v2250_v33  ;;  %v958_v18 = vrot.slane %v2374_v56, %v2253_v34  ;;  %v2417_v24 = vrot.slane %v2374_v56, %v2256_v35 }
 0x2b3   : > { %1857 = vset.pattern.permute.xlu0 %v2020_v30  ;;  %1860 = vset.pattern.permute.xlu1 %v2017_v27  ;;  %v2431_v40 = vmul.f32 %v2374_v56, %v2279_v9  ;;  %v2435_v41 = vrot.slane %v2374_v56, %v1061_v22  ;;  %v2456_v55 = vrot.slane %v2374_v56, %v1113_v43 }
 0x2b4   : > { %1226 = vperm.xlu0 %1857, %v796_v32   ;;  %978 = vperm.xlu1 %1860, %v1746_v36   ;;  %v848_v2 = vmul.f32 %v846_v62, %v2384_v61  ;;  %v908_v8 = vmul.f32 %v906_v6, %v2384_v61  ;;  %v960_v25 = vmul.f32 %v958_v18, %v2384_v61  ;;  %v2420_v32 = vsub.f32 0.0, %v1915_v19 }
 0x2b5   : > { %v1012_v42 = vmul.f32 %v2417_v24, %v2384_v61  ;;  %v1064_v51 = vmul.f32 %v2435_v41, %v2384_v61  ;;  %v2471_v19 = vrot.slane %v2374_v56, %v1165_v49 }
 0x2b6   : > { %v851_v7 = vmul.f32 1.442695, %v848_v2  ;;  %v911_v15 = vmul.f32 1.442695, %v908_v8  ;;  %v847_v45 = vmul.f32 %v846_v62, %v2420_v32 }
 0x2b7   : > { %v1015_v54 = vmul.f32 1.442695, %v1012_v42  ;;  %v1116_v42 = vmul.f32 %v2456_v55, %v2384_v61 }
 0x2b8   : > { %1859 = vset.pattern.permute.xlu0 %v2014_v20  ;;  %1862 = vset.pattern.permute.xlu1 %v2019_v29  ;;  %1916 = vpow2.f32 %v851_v7  ;;  %v849_v60 = vmul.f32 1.442695, %v847_v45  ;;  %v2468_v7 = vrot.slane %v2431_v40, %v2253_v34 }
 0x2b9   : > { %926 = vperm.xlu0 %1859, %v1746_v36   ;;  %1082 = vperm.xlu1 %1862, %v1746_v36   ;;  %1918 = vpow2.f32 %v911_v15  ;;  %v1067_v15 = vmul.f32 1.442695, %v1064_v51  ;;  %v1168_v51 = vmul.f32 %v2471_v19, %v2384_v61 }
 0x2bd   : > { %1861 = vset.pattern.permute.xlu0 %v2016_v26  ;;  %1864 = vset.pattern.permute.xlu1 %v2021_v31 }
 0x2be   : > { %1030 = vperm.xlu0 %1861, %v1746_v36   ;;  %1186 = vperm.xlu1 %1864, %v1746_v36  }
 0x2c2   : > { %1863 = vset.pattern.permute.xlu0 %v2018_v28  ;;  %1866 = vset.pattern.permute.xlu1 %v2015_v21 }
 0x2c3   : > { %1134 = vperm.xlu0 %1863, %v1746_v36   ;;  %865 = vperm.xlu1 %1866, %v806_v38  }
 0x2c5   : > { %v1917_v46 = vpop.eup %1916 }
 0x2c6   : > { %v1268_v59 = vmul.f32 0.0, %v1917_v46  ;;  %v1919_v63 = vpop.eup %1918 }
 0x2c7   : > { %1865 = vset.pattern.permute.xlu0 %v2020_v30  ;;  %1867 = vset.pattern.permute.xlu1 %v2014_v20 }
 0x2c8   : > { %1238 = vperm.xlu0 %1865, %v1746_v36   ;;  %922 = vperm.xlu1 %1867, %v806_v38  }
 0x2cc   : > { %1875 = vset.pattern.permute.xlu0 %v2014_v20  ;;  %1868 = vset.pattern.permute.xlu1 %v2017_v27 }
 0x2cd   : > { %974 = vperm.xlu1 %1868, %v806_v38   ;;  %942 = vperm.xlu0 %1875, %v1749_v39  }
 0x2d1   : > { %1869 = vset.pattern.permute.xlu1 %v2016_v26  ;;  %1877 = vset.pattern.permute.xlu0 %v2016_v26 }
 0x2d2   : > { %1026 = vperm.xlu1 %1869, %v806_v38   ;;  %1046 = vperm.xlu0 %1877, %v1749_v39  }
 0x2d6   : > { %1870 = vset.pattern.permute.xlu1 %v2019_v29  ;;  %1878 = vset.pattern.permute.xlu0 %v2019_v29 }
 0x2d7   : > { %1078 = vperm.xlu1 %1870, %v806_v38   ;;  %1098 = vperm.xlu0 %1878, %v1749_v39  }
 0x2db   : > { %1871 = vset.pattern.permute.xlu1 %v2018_v28  ;;  %1880 = vset.pattern.permute.xlu0 %v2021_v31 }
 0x2dc   : > { %1130 = vperm.xlu1 %1871, %v806_v38   ;;  %1202 = vperm.xlu0 %1880, %v1749_v39  }
 0x2e0   : > { %1872 = vset.pattern.permute.xlu1 %v2021_v31  ;;  %1882 = vset.pattern.permute.xlu0 %v2015_v21 }
 0x2e1   : > { %1182 = vperm.xlu1 %1872, %v806_v38   ;;  %883 = vperm.xlu0 %1882, %v816_v44  }
 0x2e5   : > { %1873 = vset.pattern.permute.xlu1 %v2020_v30  ;;  %1884 = vset.pattern.permute.xlu0 %v2017_v27 }
 0x2e6   : > { %1234 = vperm.xlu1 %1873, %v806_v38   ;;  %990 = vperm.xlu0 %1884, %v816_v44  }
 0x2ea   : > { %1874 = vset.pattern.permute.xlu1 %v2015_v21  ;;  %1887 = vset.pattern.permute.xlu0 %v2018_v28 }
 0x2eb   : > { %888 = vperm.xlu1 %1874, %v1749_v39   ;;  %1146 = vperm.xlu0 %1887, %v816_v44  }
 0x2ef   : > { %1876 = vset.pattern.permute.xlu1 %v2017_v27  ;;  %1889 = vset.pattern.permute.xlu0 %v2020_v30 }
 0x2f0   : > { %994 = vperm.xlu1 %1876, %v1749_v39   ;;  %1250 = vperm.xlu0 %1889, %v816_v44  }
 0x2f4   : > { %1879 = vset.pattern.permute.xlu1 %v2018_v28  ;;  %1890 = vset.pattern.permute.xlu0 %v2015_v21 }
 0x2f5   : > { %1150 = vperm.xlu1 %1879, %v1749_v39   ;;  %898 = vperm.xlu0 %1890, %v1752_v47  }
 0x2f9   : > { %1881 = vset.pattern.permute.xlu1 %v2020_v30  ;;  %1892 = vset.pattern.permute.xlu0 %v2017_v27 }
 0x2fa   : > { %1254 = vperm.xlu1 %1881, %v1749_v39   ;;  %1002 = vperm.xlu0 %1892, %v1752_v47   ;;  %v2426_v39 = vpop.f32.mrf.mxu0 }
 0x2fe   : > { %1883 = vset.pattern.permute.xlu1 %v2014_v20  ;;  %1895 = vset.pattern.permute.xlu0 %v2018_v28 }
 0x2ff   : > { %938 = vperm.xlu1 %1883, %v816_v44   ;;  %1158 = vperm.xlu0 %1895, %v1752_v47  }
 0x303   : > { %1885 = vset.pattern.permute.xlu1 %v2016_v26  ;;  %1905 = vset.pattern.permute.xlu0 %v2020_v30 }
 0x304   : > { %1042 = vperm.xlu1 %1885, %v816_v44   ;;  %1262 = vperm.xlu0 %1905, %v1752_v47  }
 0x307   : > { %v2371_v52 = vpop.permute.xlu1 %918  ;;  %v861_v53 = vpop.permute.xlu0 %860 }
 0x308   : > { %1886 = vset.pattern.permute.xlu1 %v2019_v29 }
 0x309   : > { %1094 = vperm.xlu1 %1886, %v816_v44  }
 0x30c   : > { %v2376_v57 = vpop.permute.xlu1 %1022  ;;  %v2378_v58 = vpop.permute.xlu0 %970 }
 0x30d   : > { %1888 = vset.pattern.permute.xlu1 %v2021_v31 }
 0x30e   : > { %1198 = vperm.xlu1 %1888, %v816_v44   ;;  %v963_v44 = vmul.f32 1.442695, %v960_v25 }
 0x310   : > { %1920 = vpow2.f32 %v963_v44 }
 0x311   : > { %v2388_v0 = vpop.permute.xlu1 %1126  ;;  %v2390_v1 = vpop.permute.xlu0 %1074  ;;  %1922 = vpow2.f32 %v1015_v54  ;;  %v1119_v54 = vmul.f32 1.442695, %v1116_v42 }
 0x312   : > { %1891 = vset.pattern.permute.xlu1 %v2014_v20  ;;  %1924 = vpow2.f32 %v849_v60 }
 0x313   : > { %950 = vperm.xlu1 %1891, %v1752_v47   ;;  %1926 = vpow2.f32 %v1067_v15 }
 0x316   : > { %v2394_v3 = vpop.permute.xlu1 %1230  ;;  %v2396_v5 = vpop.permute.xlu0 %1178 }
 0x317   : > { %1893 = vset.pattern.permute.xlu1 %v2016_v26 }
 0x318   : > { %1054 = vperm.xlu1 %1893, %v1752_v47  }
 0x31b   : > { %v2402_v10 = vpop.permute.xlu1 %966  ;;  %v2404_v13 = vpop.permute.xlu0 %855 }
 0x31c   : > { %1894 = vset.pattern.permute.xlu1 %v2019_v29 }
 0x31d   : > { %1106 = vperm.xlu1 %1894, %v1752_v47  }
 0x320   : > { %v2407_v16 = vpop.permute.xlu1 %1070  ;;  %v2409_v17 = vpop.permute.xlu0 %914 }
 0x321   : > { %1896 = vset.pattern.permute.xlu1 %v2021_v31 }
 0x322   : > { %1210 = vperm.xlu1 %1896, %v1752_v47  }
 0x325   : > { %v2422_v36 = vpop.permute.xlu1 %1174  ;;  %v2424_v38 = vpop.permute.xlu0 %1018 }
 0x326   : > { %1897 = vset.pattern.permute.xlu1 %v2015_v21  ;;  %v2445_v21 = vrot.slane %v2431_v40, %v2262_v37 }
 0x327   : > { %893 = vperm.xlu1 %1897, %v2426_v39  }
 0x32a   : > { %v2441_v47 = vpop.permute.xlu0 %1122  ;;  %v871_v48 = vpop.permute.xlu1 %870 }
 0x32b   : > { %v874_v50 = vsel %vm385_vm4, %v861_v53, %v871_v48  ;;  %1898 = vset.pattern.permute.xlu1 %v2014_v20  ;;  %v1217_v20 = vsub.s32 7, %v2167_v12  ;;  %v907_v53 = vmul.f32 %v906_v6, %v2420_v32  ;;  %v2493_v48 = vrot.slane %v2431_v40, %v1061_v22 }
 0x32c   : > { %v880_v37 = vmul.f32 %v2445_v21, %v874_v50  ;;  %946 = vperm.xlu1 %1898, %v2426_v39  }
 0x32d   : > { %v2485_v44 = vrot.slane %v2374_v56, %v1217_v20  ;;  %v909_v45 = vmul.f32 1.442695, %v907_v53  ;;  %v1171_v53 = vmul.f32 1.442695, %v1168_v51 }
 0x32e   : > { %v2460_v62 = vadd.f32 %v1268_v59, %v880_v37 }
 0x32f   : > { %v2464_v2 = vpop.permute.xlu0 %1226  ;;  %v979_v8 = vpop.permute.xlu1 %978  ;;  %v1220_v59 = vmul.f32 %v2485_v44, %v2384_v61  ;;  %1928 = vpow2.f32 %v909_v45 }
 0x330   : > { %v982_v25 = vsel %vm385_vm4, %v2378_v58, %v979_v8  ;;  %1899 = vset.pattern.permute.xlu1 %v2017_v27  ;;  %v1272_v6 = vmul.f32 %v1919_v63, %v2460_v62  ;;  %v2489_v58 = vrot.slane %v2431_v40, %v2250_v33  ;;  %v959_v27 = vmul.f32 %v958_v18, %v2420_v32 }
 0x331   : > { %v988_v34 = vmul.f32 %v2468_v7, %v982_v25  ;;  %998 = vperm.xlu1 %1899, %v2426_v39   ;;  %1930 = vpow2.f32 %v1119_v54  ;;  %v2518_v8 = vrot.slane %v2431_v40, %v1165_v49 }
 0x332   : > { %v961_v37 = vmul.f32 1.442695, %v959_v27 }
 0x334   : > { %v927_v46 = vpop.permute.xlu0 %926  ;;  %v1083_v50 = vpop.permute.xlu1 %1082  ;;  %1932 = vpow2.f32 %v961_v37  ;;  %v1115_v37 = vmul.f32 %v2456_v55, %v2420_v32 }
 0x335   : > { %v930_v56 = vsel %vm385_vm4, %v2371_v52, %v927_v46  ;;  %v1086_v33 = vsel %vm385_vm4, %v2390_v1, %v1083_v50  ;;  %1900 = vset.pattern.permute.xlu1 %v2016_v26  ;;  %v1011_v52 = vmul.f32 %v2417_v24, %v2420_v32  ;;  %v1921_v1 = vpop.eup %1920  ;;  %v2515_v26 = vrot.slane %v2431_v40, %v2256_v35 }
 0x336   : > { %v936_v18 = vmul.f32 %v2489_v58, %v930_v56  ;;  %v1092_v22 = vmul.f32 %v2493_v48, %v1086_v33  ;;  %1050 = vperm.xlu1 %1900, %v2426_v39   ;;  %v1923_v45 = vpop.eup %1922  ;;  %1934 = vpow2.f32 %v1171_v53  ;;  %v1063_v46 = vmul.f32 %v2435_v41, %v2420_v32 }
 0x337   : > { %v1013_v49 = vmul.f32 1.442695, %v1011_v52  ;;  %v2561_v52 = vrot.slane %v2431_v40, %v1217_v20 }
 0x338   : > { %v2511_v60 = vadd.f32 %v1272_v6, %v936_v18  ;;  %v1223_v6 = vmul.f32 1.442695, %v1220_v59  ;;  %v1065_v59 = vmul.f32 1.442695, %v1063_v46 }
 0x339   : > { %v1031_v63 = vpop.permute.xlu0 %1030  ;;  %v1187_v15 = vpop.permute.xlu1 %1186 }
 0x33a   : > { %v1276_v61 = vmul.f32 %v1921_v1, %v2511_v60  ;;  %v1034_v24 = vsel %vm385_vm4, %v2376_v57, %v1031_v63  ;;  %v1190_v25 = vsel %vm385_vm4, %v2396_v5, %v1187_v15  ;;  %1901 = vset.pattern.permute.xlu1 %v2019_v29  ;;  %v1925_v57 = vpop.eup %1924  ;;  %v2539_v29 = vrot.slane %v2431_v40, %v1113_v43 }
 0x33b   : > { %v1040_v35 = vmul.f32 %v2515_v26, %v1034_v24  ;;  %v1196_v42 = vmul.f32 %v2518_v8, %v1190_v25  ;;  %1102 = vperm.xlu1 %1901, %v2426_v39   ;;  %1936 = vpow2.f32 %v1223_v6  ;;  %v1267_v33 = vmul.f32 0.0, %v1925_v57  ;;  %v1927_v18 = vpop.eup %1926 }
 0x33c   : > { %v2531_v27 = vadd.f32 %v1276_v61, %v988_v34  ;;  %1938 = vpow2.f32 %v1013_v49  ;;  %v1117_v61 = vmul.f32 1.442695, %v1115_v37 }
 0x33d   : > { %1940 = vpow2.f32 %v1065_v59 }
 0x33e   : > { %v1280_v5 = vmul.f32 %v1923_v45, %v2531_v27  ;;  %v1135_v50 = vpop.permute.xlu0 %1134  ;;  %v866_v51 = vpop.permute.xlu1 %865  ;;  %1942 = vpow2.f32 %v1117_v61  ;;  %v1480_v61 = vld [vmem:[%s2846_s9 + $0x68] sm:$0xff] }
 0x33f   : > { %v1138_v34 = vsel %vm385_vm4, %v2388_v0, %v1135_v50  ;;  %v873_v54 = vsel %vm385_vm4, %v2404_v13, %v866_v51  ;;  %1902 = vset.pattern.permute.xlu1 %v2018_v28  ;;  %v1929_v28 = vpop.eup %1928  ;;  %v1219_v50 = vmul.f32 %v2485_v44, %v2420_v32 }
 0x340   : > { %v2548_v41 = vadd.f32 %v1280_v5, %v1040_v35  ;;  %v1144_v56 = vmul.f32 %v2539_v29, %v1138_v34  ;;  %v879_v43 = vmul.f32 %v2445_v21, %v873_v54  ;;  %1154 = vperm.xlu1 %1902, %v2426_v39   ;;  %v1931_v12 = vpop.eup %1930 }
 0x342   : > { %v1284_v0 = vmul.f32 %v1927_v18, %v2548_v41  ;;  %v2556_v13 = vadd.f32 %v1267_v33, %v879_v43  ;;  %v1221_v43 = vmul.f32 1.442695, %v1219_v50  ;;  %v1474_v50 = vld [vmem:[%s2846_s9 + $0x38] sm:$0xff] }
 0x343   : > { %v1239_v53 = vpop.permute.xlu0 %1238  ;;  %v923_v21 = vpop.permute.xlu1 %922 }
 0x344   : > { %v1242_v1 = vsel %vm385_vm4, %v2394_v3, %v1239_v53  ;;  %v929_v63 = vsel %vm385_vm4, %v2409_v17, %v923_v21  ;;  %1903 = vset.pattern.permute.xlu1 %v2021_v31  ;;  %v2570_v55 = vadd.f32 %v1284_v0, %v1092_v22  ;;  %v1271_v15 = vmul.f32 %v1929_v28, %v2556_v13  ;;  %v1933_v31 = vpop.eup %1932 }
 0x345   : > { %v1248_v40 = vmul.f32 %v2561_v52, %v1242_v1  ;;  %v935_v20 = vmul.f32 %v2489_v58, %v929_v63  ;;  %1206 = vperm.xlu1 %1903, %v2426_v39   ;;  %v1167_v17 = vmul.f32 %v2471_v19, %v2420_v32  ;;  %v1935_v35 = vpop.eup %1934 }
 0x346   : > { %v1288_v3 = vmul.f32 %v1931_v12, %v2570_v55 }
 0x347   : > { %v2579_v24 = vadd.f32 %v1271_v15, %v935_v20  ;;  %v1169_v46 = vmul.f32 1.442695, %v1167_v17  ;;  %v1481_v15 = vld [vmem:[%s2846_s9 + $0x70] sm:$0xff]  ;;  %v1479_v17 = vld [vmem:[%s2846_s9 + $0x60] sm:$0xff] }
 0x348   : > { %v975_v22 = vpop.permute.xlu1 %974  ;;  %v2581_v25 = vpop.permute.xlu0 %942  ;;  %v2583_v6 = vadd.f32 %v1288_v3, %v1144_v56 }
 0x349   : > { %v981_v58 = vsel %vm385_vm4, %v2402_v10, %v975_v22  ;;  %1904 = vset.pattern.permute.xlu1 %v2020_v30  ;;  %v1275_v49 = vmul.f32 %v1933_v31, %v2579_v24  ;;  %v1937_v57 = vpop.eup %1936  ;;  %1944 = vpow2.f32 %v1169_v46 }
 0x34a   : > { %v987_v19 = vmul.f32 %v2468_v7, %v981_v58  ;;  %1258 = vperm.xlu1 %1904, %v2426_v39   ;;  %v1292_v45 = vmul.f32 %v1935_v35, %v2583_v6  ;;  %v1939_v5 = vpop.eup %1938  ;;  %1946 = vpow2.f32 %v1221_v43 }
 0x34c   : > { %v2595_v51 = vadd.f32 %v1292_v45, %v1196_v42  ;;  %v2597_v10 = vadd.f32 %v1275_v49, %v987_v19  ;;  %v1941_v42 = vpop.eup %1940  ;;  %v1477_v45 = vld [vmem:[%s2846_s9 + $0x50] sm:$0xff] }
 0x34d   : > { %v1027_v30 = vpop.permute.xlu1 %1026  ;;  %v2599_v34 = vpop.permute.xlu0 %1046 }
 0x34e   : > { %v1033_v7 = vsel %vm385_vm4, %v2424_v38, %v1027_v30  ;;  %v1296_v39 = vmul.f32 %v1937_v57, %v2595_v51  ;;  %v1279_v54 = vmul.f32 %v1939_v5, %v2597_v10 }
 0x34f   : > { %v1039_v56 = vmul.f32 %v2515_v26, %v1033_v7  ;;  %v1943_v26 = vpop.eup %1942 }
 0x350   : > { %v2607_v32 = vadd.f32 %v1296_v39, %v1248_v40  ;;  %v1473_v39 = vld [vmem:[%s2846_s9 + $0x30] sm:$0xff] }
 0x351   : > { %v2609_v44 = vadd.f32 %v1279_v54, %v1039_v56  ;;  %v1472_v54 = vld [vmem:[%s2846_s9 + $0x28] sm:$0xff]  ;;  %v1471_v56 = vld [vmem:[%s2846_s9 + $0x20] sm:$0xff] }
 0x352   : > { %v1079_v33 = vpop.permute.xlu1 %1078  ;;  %v2611_v18 = vpop.permute.xlu0 %1098 }
 0x353   : > { %v1085_v38 = vsel %vm385_vm4, %v2407_v16, %v1079_v33  ;;  %v1283_v59 = vmul.f32 %v1941_v42, %v2609_v44 }
 0x354   : > { %v1091_v0 = vmul.f32 %v2493_v48, %v1085_v38  ;;  %v1482_v48 = vld [vmem:[%s2846_s9 + $0x78] sm:$0xff] }
 0x355   : > { %1759 = vmatpush3.msra.mxu0 %v1482_v48  ;;  %v1470_v38 = vld [vmem:[%s2846_s9 + $0x18] sm:$0xff] }
 0x356   : > { %v2618_v37 = vadd.f32 %v1283_v59, %v1091_v0  ;;  %v1945_v12 = vpop.eup %1944  ;;  %1760 = vmatprep.subr.mxu0 %v2012_v4  ;;  %v1469_v0 = vld [vmem:[%s2846_s9 + $0x10] sm:$0xff] }
 0x357   : > { %v1131_v28 = vpop.permute.xlu1 %1130  ;;  %v2620_v53 = vpop.permute.xlu0 %1202  ;;  %1761 = vmatpush3.msra.mxu0 %v1481_v15 }
 0x358   : > { %v1137_v21 = vsel %vm385_vm4, %v2441_v47, %v1131_v28  ;;  %v1287_v1 = vmul.f32 %v1943_v26, %v2618_v37  ;;  %1762 = vmatprep.subr.mxu0 %v2012_v4 }
 0x359   : > { %v1143_v63 = vmul.f32 %v2539_v29, %v1137_v21  ;;  %1763 = vmatpush3.msra.mxu0 %v1480_v61 }
 0x35a   : > { %1764 = vmatprep.subr.mxu0 %v2012_v4 }
 0x35b   : > { %v2627_v16 = vadd.f32 %v1287_v1, %v1143_v63  ;;  %1765 = vmatpush3.msra.mxu0 %v1479_v17 }
 0x35c   : > { %v1183_v40 = vpop.permute.xlu1 %1182  ;;  %v2635_v20 = vpop.permute.xlu0 %883  ;;  %1766 = vmatprep.subr.mxu0 %v2012_v4 }
 0x35d   : > { %v1189_v47 = vsel %vm385_vm4, %v2422_v36, %v1183_v40  ;;  %v1291_v29 = vmul.f32 %v1945_v12, %v2627_v16  ;;  %v1947_v36 = vpop.eup %1946 }
 0x35e   : > { %v1195_v3 = vmul.f32 %v2518_v8, %v1189_v47  ;;  %v1478_v8 = vld [vmem:[%s2846_s9 + $0x58] sm:$0xff] }
 0x35f   : > { %1767 = vmatpush3.msra.mxu0 %v1478_v8 }
 0x360   : > { %v2650_v31 = vadd.f32 %v1291_v29, %v1195_v3  ;;  %1768 = vmatprep.subr.mxu0 %v2012_v4 }
 0x361   : > { %v1235_v22 = vpop.permute.xlu1 %1234  ;;  %v2652_v35 = vpop.permute.xlu0 %990  ;;  %1769 = vmatpush3.msra.mxu0 %v1477_v45 }
 0x362   : > { %v1241_v58 = vsel %vm385_vm4, %v2464_v2, %v1235_v22  ;;  %v1295_v49 = vmul.f32 %v1947_v36, %v2650_v31  ;;  %v1476_v2 = vld [vmem:[%s2846_s9 + $0x48] sm:$0xff]  ;;  %1770 = vmatprep.subr.mxu0 %v2012_v4 }
 0x363   : > { %v1247_v19 = vmul.f32 %v2561_v52, %v1241_v58  ;;  %v1475_v52 = vld [vmem:[%s2846_s9 + $0x40] sm:$0xff]  ;;  %1771 = vmatpush3.msra.mxu0 %v1476_v2 }
 0x364   : > { %1772 = vmatprep.subr.mxu0 %v2012_v4 }
 0x365   : > { %v2667_v57 = vadd.f32 %v1295_v49, %v1247_v19  ;;  %1773 = vmatpush3.msra.mxu0 %v1475_v52 }
 0x366   : > { %v889_v46 = vpop.permute.xlu1 %888  ;;  %v2673_v5 = vpop.permute.xlu0 %1146  ;;  %1774 = vmatprep.subr.mxu0 %v2012_v4 }
 0x367   : > { %1775 = vmatpush3.msra.mxu0 %v1474_v50 }
 0x368   : > { %1776 = vmatprep.subr.mxu0 %v2012_v4 }
 0x369   : > { %1777 = vmatpush3.msra.mxu0 %v1473_v39 }
 0x36a   : > { %1778 = vmatprep.subr.mxu0 %v2012_v4 }
 0x36b   : > { %v995_v30 = vpop.permute.xlu1 %994  ;;  %v2683_v7 = vpop.permute.xlu0 %1250  ;;  %1779 = vmatpush3.msra.mxu0 %v1472_v54 }
 0x36c   : > { %1780 = vmatprep.subr.mxu0 %v2012_v4 }
 0x36d   : > { %1781 = vmatpush3.msra.mxu0 %v1471_v56 }
 0x36e   : > { %1782 = vmatprep.subr.mxu0 %v2012_v4 }
 0x36f   : > { %1783 = vmatpush3.msra.mxu0 %v1470_v38 }
 0x370   : > { %v1151_v43 = vpop.permute.xlu1 %1150  ;;  %v899_v42 = vpop.permute.xlu0 %898  ;;  %1784 = vmatprep.subr.mxu0 %v2012_v4 }
 0x371   : > { %v902_v33 = vsel %vm385_vm4, %v889_v46, %v899_v42  ;;  %1785 = vmatpush3.msra.mxu0 %v1469_v0 }
 0x372   : > { %v1300_v59 = vmul.f32 %v2460_v62, %v902_v33  ;;  %1786 = vmatprep.subr.mxu0 %v2012_v4 }
 0x375   : > { %v1255_v26 = vpop.permute.xlu1 %1254  ;;  %v1003_v28 = vpop.permute.xlu0 %1002 }
 0x376   : > { %v1006_v21 = vsel %vm385_vm4, %v995_v30, %v1003_v28 }
 0x377   : > { %v1318_v1 = vmul.f32 %v2531_v27, %v1006_v21 }
 0x37a   : > { %v939_v62 = vpop.permute.xlu1 %938  ;;  %v1159_v63 = vpop.permute.xlu0 %1158 }
 0x37b   : > { %v1162_v48 = vsel %vm385_vm4, %v1151_v43, %v1159_v63 }
 0x37c   : > { %v2716_v15 = vmul.f32 %v2583_v6, %v1162_v48 }
 0x37f   : > { %v1043_v12 = vpop.permute.xlu1 %1042  ;;  %v1263_v40 = vpop.permute.xlu0 %1262 }
 0x380   : > { %v1266_v47 = vsel %vm385_vm4, %v1255_v26, %v1263_v40 }
 0x381   : > { %v2721_v29 = vmul.f32 %v2607_v32, %v1266_v47 }
 0x384   : > { %v1095_v61 = vpop.permute.xlu1 %1094 }
 0x389   : > { %v2723_v27 = vpop.permute.xlu1 %1198 }
 0x38e   : > { %v951_v3 = vpop.permute.xlu1 %950 }
 0x38f   : > { %v954_v49 = vsel %vm385_vm4, %v2581_v25, %v951_v3 }
 0x390   : > { %v1309_v46 = vmul.f32 %v2511_v60, %v954_v49 }
 0x393   : > { %v1055_v17 = vpop.permute.xlu1 %1054 }
 0x394   : > { %v1058_v42 = vsel %vm385_vm4, %v2599_v34, %v1055_v17 }
 0x395   : > { %v1327_v0 = vmul.f32 %v2548_v41, %v1058_v42 }
 0x398   : > { %v1107_v36 = vpop.permute.xlu1 %1106 }
 0x399   : > { %v1110_v21 = vsel %vm385_vm4, %v2611_v18, %v1107_v36 }
 0x39d   : > { %v1211_v22 = vpop.permute.xlu1 %1210 }
 0x3a2   : > { %v894_v8 = vpop.permute.xlu1 %893 }
 0x3a3   : > { %v901_v6 = vsel %vm385_vm4, %v2635_v20, %v894_v8 }
 0x3a4   : > { %v1299_v58 = vmul.f32 %v2556_v13, %v901_v6 }
 0x3a6   : > { %v1301_v32 = vadd.f32 %v1300_v59, %v1299_v58 }
 0x3a7   : > { %v947_v19 = vpop.permute.xlu1 %946 }
 0x3a8   : > { %v1302_v45 = vrot.slane %v1301_v32, 4  ;;  %v953_v2 = vsel %vm385_vm4, %v939_v62, %v947_v19 }
 0x3a9   : > { %v1308_v52 = vmul.f32 %v2579_v24, %v953_v2 }
 0x3aa   : > { %v1303_v50 = vadd.f32 %v1302_v45, %v1301_v32 }
 0x3ab   : > { %v1310_v30 = vadd.f32 %v1309_v46, %v1308_v52 }
 0x3ac   : > { %v1304_v39 = vrot.slane %v1303_v50, 2  ;;  %v999_v20 = vpop.permute.xlu1 %998 }
 0x3ad   : > { %v1311_v54 = vrot.slane %v1310_v30, 4  ;;  %v1005_v13 = vsel %vm385_vm4, %v2652_v35, %v999_v20 }
 0x3ae   : > { %v1317_v25 = vmul.f32 %v2597_v10, %v1005_v13  ;;  %v1305_v56 = vadd.f32 %v1304_v39, %v1303_v50 }
 0x3af   : > { %v1312_v43 = vadd.f32 %v1311_v54, %v1310_v30 }
 0x3b0   : > { %v1319_v60 = vadd.f32 %v1318_v1, %v1317_v25  ;;  %v1306_v26 = vrot.slane %v1305_v56, 1 }
 0x3b1   : > { %v1313_v33 = vrot.slane %v1312_v43, 2  ;;  %v1051_v24 = vpop.permute.xlu1 %1050 }
 0x3b2   : > { %v1320_v38 = vrot.slane %v1319_v60, 4  ;;  %v1057_v59 = vsel %vm385_vm4, %v1043_v12, %v1051_v24  ;;  %v1307_v48 = vadd.f32 %v1306_v26, %v1305_v56  ;;  %v1336_v12 = vmul.f32 %v2570_v55, %v1110_v21 }
 0x3b3   : > { %v1314_v28 = vadd.f32 %v1313_v33, %v1312_v43  ;;  %v1326_v35 = vmul.f32 %v2609_v44, %v1057_v59 }
 0x3b4   : > { %v1321_v10 = vadd.f32 %v1320_v38, %v1319_v60 }
 0x3b5   : > { %v1315_v62 = vrot.slane %v1314_v28, 1  ;;  %v1328_v34 = vadd.f32 %v1327_v0, %v1326_v35 }
 0x3b6   : > { %v1322_v1 = vrot.slane %v1321_v10, 2  ;;  %v1103_v63 = vpop.permute.xlu1 %1102 }
 0x3b7   : > { %v1316_v40 = vadd.f32 %v1315_v62, %v1314_v28  ;;  %v1329_v47 = vrot.slane %v1328_v34, 4  ;;  %v1109_v41 = vsel %vm385_vm4, %v1095_v61, %v1103_v63 }
 0x3b8   : > { %v1323_v3 = vadd.f32 %v1322_v1, %v1321_v10  ;;  %v1335_v44 = vmul.f32 %v2618_v37, %v1109_v41  ;;  %v1214_v37 = vsel %vm385_vm4, %v2620_v53, %v1211_v22 }
 0x3b9   : > { %v1372_v17 = vsel %vm1371_vm9, %v1307_v48, %v1316_v40  ;;  %v1330_v8 = vadd.f32 %v1329_v47, %v1328_v34  ;;  %v1354_v54 = vmul.f32 %v2595_v51, %v1214_v37 }
 0x3ba   : > { %v1324_v6 = vrot.slane %v1323_v3, 1  ;;  %v1337_v18 = vadd.f32 %v1336_v12, %v1335_v44  ;;  %v1468_v12 = vld [vmem:[%s2846_s9 + $0x8] sm:$0xff] }
 0x3bb   : > { %v1331_v36 = vrot.slane %v1330_v8, 2  ;;  %v1155_v58 = vpop.permute.xlu1 %1154  ;;  %1787 = vmatpush3.msra.mxu0 %v1468_v12 }
 0x3bc   : > { %v1325_v49 = vadd.f32 %v1324_v6, %v1323_v3  ;;  %v1338_v32 = vrot.slane %v1337_v18, 4  ;;  %v1161_v19 = vsel %vm385_vm4, %v2673_v5, %v1155_v58  ;;  %v1467_v3 = vld [vmem:[%s2846_s9] sm:$0xff]  ;;  %1788 = vmatprep.subr.mxu0 %v2012_v4 }
 0x3bd   : > { %v1332_v45 = vadd.f32 %v1331_v36, %v1330_v8  ;;  %v1344_v61 = vmul.f32 %v2627_v16, %v1161_v19  ;;  %1789 = vmatpush3.msra.mxu0 %v1467_v3  ;;  %v1647_v4 = vld [vmem:[%s2847_s10] ss:$0 sm:$0xff] }
 0x3be   : > { %v1374_v55 = vsel %vm1373_vm10, %v1372_v17, %v1325_v49  ;;  %v1339_v2 = vadd.f32 %v1338_v32, %v1337_v18 }
 0x3bf   : > { %v1333_v46 = vrot.slane %v1332_v45, 1  ;;  %v1346_v52 = vadd.f32 %v2716_v15, %v1344_v61 }
 0x3c0   : > { %v1340_v50 = vrot.slane %v1339_v2, 2  ;;  %v1207_v30 = vpop.permute.xlu1 %1206 }
 0x3c1   : > { %v1334_v39 = vadd.f32 %v1333_v46, %v1332_v45  ;;  %v1347_v20 = vrot.slane %v1346_v52, 4  ;;  %v1213_v5 = vsel %vm385_vm4, %v2723_v27, %v1207_v30 }
 0x3c2   : > { %v1341_v16 = vadd.f32 %v1340_v50, %v1339_v2  ;;  %v1353_v13 = vmul.f32 %v2650_v31, %v1213_v5 }
 0x3c3   : > { %v1375_v25 = vsel %vm555_vm5, %v1374_v55, %v1334_v39  ;;  %v1348_v56 = vadd.f32 %v1347_v20, %v1346_v52 }
 0x3c4   : > { %v1342_v53 = vrot.slane %v1341_v16, 1  ;;  %v1355_v22 = vadd.f32 %v1354_v54, %v1353_v13 }
 0x3c5   : > { %v1349_v43 = vrot.slane %v1348_v56, 2  ;;  %v1259_v15 = vpop.permute.xlu1 %1258 }
 0x3c6   : > { %v1343_v42 = vadd.f32 %v1342_v53, %v1341_v16  ;;  %v1356_v60 = vrot.slane %v1355_v22, 4  ;;  %v1265_v33 = vsel %vm385_vm4, %v2683_v7, %v1259_v15 }
 0x3c7   : > { %v1350_v27 = vadd.f32 %v1349_v43, %v1348_v56  ;;  %v1362_v51 = vmul.f32 %v2667_v57, %v1265_v33  ;;  %v1645_v57 = vld [vmem:[%s2845_s8] ss:$0 sm:$0xff] }
 0x3c8   : > { %v1357_v24 = vadd.f32 %v1356_v60, %v1355_v22  ;;  %v1377_v38 = vsel %vm1376_vm11, %v1375_v25, %v1343_v42 }
 0x3c9   : > { %v1351_v31 = vrot.slane %v1350_v27, 1  ;;  %v1364_v59 = vadd.f32 %v2721_v29, %v1362_v51  ;;  %v1388_v29 = vmul.f32 %v1645_v57, %v2279_v9  ;;  %v1461_v9 = vmul.f32 0.5, %v2314_v23 }
 0x3ca   : > { %v1358_v0 = vrot.slane %v1357_v24, 2 }
 0x3cb   : > { %v1352_v26 = vadd.f32 %v1351_v31, %v1350_v27  ;;  %v1365_v28 = vrot.slane %v1364_v59, 4  ;;  %1948 = vtanh.f32 %v1461_v9 }
 0x3cc   : > { %v1359_v35 = vadd.f32 %v1358_v0, %v1357_v24 }
 0x3cd   : > { %v1366_v10 = vadd.f32 %v1365_v28, %v1364_v59  ;;  %v1378_v21 = vsel %vm608_vm8, %v1377_v38, %v1352_v26 }
 0x3ce   : > { %v1360_v62 = vrot.slane %v1359_v35, 1 }
 0x3cf   : > { %v1367_v34 = vrot.slane %v1366_v10, 2 }
 0x3d0   : > { %v1361_v1 = vadd.f32 %v1360_v62, %v1359_v35 }
 0x3d1   : > { %v1368_v63 = vadd.f32 %v1367_v34, %v1366_v10 }
 0x3d2   : > { %v1379_v7 = vsel %vm594_vm7, %v1378_v21, %v1361_v1 }
 0x3d3   : > { %v1369_v48 = vrot.slane %v1368_v63, 1 }
 0x3d5   : > { %v1370_v40 = vadd.f32 %v1369_v48, %v1368_v63 }
 0x3d7   : > { %v1380_v47 = vsel %vm580_vm6, %v1379_v7, %v1370_v40 }
 0x3d8   : > { %v1389_v41 = vadd.f32 %v1388_v29, %v1380_v47  ;;  %v1949_v44 = vpop.eup %1948 }
 0x3d9   : > { %v1463_v17 = vadd.f32 1.0, %v1949_v44 }
 0x3da   : > { %1754 = vmatpush3.msra.mxu1 %v1389_v41 }
 0x3db   : > { %1756 = vmatmul.mubr.msk.f32.vlgmr.msra.gmra.mxu1 %vm475_vm3, %v2172_v14  ;;  %v1464_v14 = vmul.f32 0.5, %v1463_v17 }
 0x3dd   : > { %v1465_v8 = vmul.f32 %v1464_v14, %v2314_v23 }
 0x49b   : > { %v1456_v6 = vpop.f32.mrf.mxu1 }
 0x49c   : > { %v1460_v18 = vsel %vm385_vm4, %v1389_v41, %v1456_v6 }
 0x49d   : > { %v1466_v36 = vmul.f32 %v1465_v8, %v1460_v18  ;;  %v1757_v58 = vpop.f32.mrf.mxu1 }
 0x49f   : > { %1791 = vmatmul.mubr.f32.vlgmr.msra.gmra.mxu0 %v1466_v36 }
 0x55f   : > { %v1556_v49 = vpop.f32.mrf.mxu0 }
 0x560   : > { %v1557_v32 = vadd.f32 %v1647_v4, %v1556_v49 }
 0x561   : > { %v1792_v11 = vpop.f32.mrf.mxu0 }
 0x562   : > { %1560 = vst.msk [vmem:[%s377_s24] sm:$0xff] %vm400_vm0, %v1557_v32 }
 0x563   : > { %1963 = shalt.err (!%p1960_p3)
}
 0x564   : > { %s1964_s16 = scalar_lea.hbm %s2801_s30, 128  ;;  %s1968_s24 = scalar_lea.hbm %s2848_s11, 256 }
 0x565   : > { %p1965_p4 = scmp.ne.s32.totalorder %s2801_s30, %s1964_s16  ;;  %p1969_p9 = scmp.lt.s32.totalorder %s2801_s30, %s2848_s11 }
 0x566   : > { %p1970_p10 = scmp.lt.s32.totalorder %s1968_s24, %s1964_s16 }
 0x567   : > { %p1966_p7 = pnand %p1965_p4, %p2121_p5 }
 0x568   : > { %p1971_p11 = por %p1970_p10, %p1969_p9 }
 0x569   : > { %p1967_p8 = pneg %p1966_p7 }
 0x56b   : > { %p1972_p12 = pnand %p1971_p11, %p1967_p8 }
 0x56d   : > { %1975 = shalt.err (!%p1972_p12)
}
 0x56e   : > { %1793 = dma.vmem_to_hbm [thread:$0]  (%p2121_p5), %s1576_s25, 128, %s2801_s30, %s1562_s12  }
 0x56f PF: > { %p1799_p13 = scmp.ge.s32.totalorder %s2010_s20, 2  ;;  %s1587_s0 = sand.u32 1, %s1998_s17  }
 0x570   : > { %s1588_s21 = scalar_lea.sflag [#allocation3], %s1587_s0 }
 0x571   : > { %p1796_p0 = pnand %p1799_p13, %p2125_p6 }
 0x573   : > { %p1797_p1 = pneg %p1796_p0 }
 0x575   : > { %1993 = dma.done.wait (%p1797_p1), %s1588_s21, 128  }
 0x576   : > { %1995 = vsyncadd (%p1797_p1), %s1588_s21, 4294967168  ;;  %s2854_s14 = sld [smem:[#allocation5_spill]]  ;;  %p21_p2 = scmp.ge.s32.totalorder %s2108_s23, 4  }
 0x577   : > { %s2855_s17 = smov %s2002_s18  ;;  %s2856_s18 = smov %s2006_s19 }
 0x578   : > { %s2858_s20 = smov %s2108_s23  ;;  %23 = sbr.rel (!%p21_p2) target bundleno = 5 (0x5), region = 99 }
 0x57c   : > { %s2857_s19 = smov %s2854_s14 }
 0x57d   :  { %1593 = vsyncpa [#allocation3], 1 }
 0x57e   :  { %1595 = vsyncpa [#allocation3 + $0x1], 1 }

</bundles_post_ra>
